<compile_context>
chip_gen: v7x
topology: tpu7x:2x2x1
jax: 0.10.0
libtpu: 0.0.40
codegen_flags: <defaults>
</compile_context>

<pallas_src>
import jax
import jax.numpy as jnp
from jax.experimental import pallas as pl
from jax.experimental.pallas import tpu as pltpu

# ---------------- synthetic model config (mirrors RCNNnet.__init__ shape logic) ----------------
CHANNEL_IN = 4
NUM_CLASS = 1
CODE_SIZE = 7                       # ResidualCoder_v1.code_size
GRID_SIZE = 2
G3 = GRID_SIZE ** 3
POOL_RADIUS = (0.8, 1.6)
NSAMPLE = (16, 16)                  # both branches share nsample -> branches fused in one matmul
MLPS = ((16,), (16,))               # per-branch MLP out channels ([channel_in] prepended implicitly)
C_OUT0 = MLPS[0][-1]
POOL_OUT = sum(m[-1] for m in MLPS)
PRE_CHANNEL = G3 * POOL_OUT         # GRID_SIZE**3 * pool_out_channel = 256
SHARED_FC = (128, 128)
CLS_FC = (128,)
REG_FC = (128,)
NMS_POST_MAXSIZE = 64
BN_EPS = 1e-5
DIN = 3 + CHANNEL_IN                # xyz + features per grouped point
DIN_PAD = 8                         # pad per-branch K 7 -> 8 (zero column / zero weight row)
KW = G3 * 2 * DIN_PAD               # 128: grouped-lane width per ROI row
PAD = 128                           # lane padding for the merged (cls||reg) head output


# =====================================================================================
# Single fused Pallas kernel: ROI-grid pooling (both radius branches, all 8 grid points,
# max over nsample) + share FC + merged cls/reg head.
# =====================================================================================
def fused_pool_head_kernel(grp_ref, mask_ref, wp_ref, bp_ref,
                           w1_ref, b1_ref, w2_ref, b2_ref,
                           wcr_ref, bcr_ref, wf_ref, bf_ref, out_ref):
    ns, rt, kw = grp_ref.shape

    # ---- pooling: one big bf16 MXU matmul over all (nsample x rows) against the block-diag MLP ----
    x = grp_ref[...].reshape(ns * rt, kw)                           # bf16, free reshape
    y = jnp.dot(x, wp_ref[...], preferred_element_type=jnp.float32)  # (ns*rt, G3*POOL_OUT) f32
    y = y.reshape(ns, rt, G3 * POOL_OUT)
    pooled = y[0]
    for s in range(1, ns):                                          # max-pool over nsample (VPU)
        pooled = jnp.maximum(pooled, y[s])
    # bias & ReLU commute with max (bias constant per column, ReLU monotone)
    pooled = jnp.maximum(pooled + bp_ref[...], 0.0)
    pooled = pooled * mask_ref[...]                                 # empty-ball zeroing (lane mask)

    # ---- head: share FC x2 -> merged cls||reg hidden -> merged padded final layer ----
    h = jnp.dot(pooled.astype(jnp.bfloat16), w1_ref[...], preferred_element_type=jnp.float32)
    h = jnp.maximum(h + b1_ref[...], 0.0)
    h = jnp.dot(h.astype(jnp.bfloat16), w2_ref[...], preferred_element_type=jnp.float32)
    h = jnp.maximum(h + b2_ref[...], 0.0)
    h2 = jnp.dot(h.astype(jnp.bfloat16), wcr_ref[...], preferred_element_type=jnp.float32)
    h2 = jnp.maximum(h2 + bcr_ref[...], 0.0)
    # final layer kept f32 (regression residuals feed exp() in decode; precision-sensitive)
    out_ref[...] = jnp.dot(h2, wf_ref[...], preferred_element_type=jnp.float32) + bf_ref[...]


def fused_pool_head(grp, mask, weights, r_tile=64):
    # r_tile=64 -> grid=(2,) parallel: feeds both v7x TensorCores; negligible cost on v5e/v6e.
    NS, R, kw = grp.shape
    r_tile = min(r_tile, R)
    assert R % r_tile == 0 and r_tile % 16 == 0 and kw == KW

    def full_spec(a):
        return pl.BlockSpec(a.shape, lambda i: (0,) * a.ndim)

    in_specs = [
        pl.BlockSpec((NS, r_tile, kw), lambda i: (0, i, 0)),        # grouped slab (whole NS axis)
        pl.BlockSpec((r_tile, G3 * POOL_OUT), lambda i: (i, 0)),    # full-width empty-ball lane mask
    ] + [full_spec(w) for w in weights]

    out = pl.pallas_call(
        fused_pool_head_kernel,
        out_shape=jax.ShapeDtypeStruct((R, PAD), jnp.float32),
        grid=(R // r_tile,),
        in_specs=in_specs,
        out_specs=pl.BlockSpec((r_tile, PAD), lambda i: (i, 0)),
        compiler_params=pltpu.CompilerParams(
            dimension_semantics=("parallel",),
            vmem_limit_bytes=32 * 1024 * 1024),   # explicit; blocks here are <1 MiB, safe on v7x too
    )(grp, mask, *weights)
    cls_preds = out[:, :NUM_CLASS]
    reg_preds = out[:, NUM_CLASS:NUM_CLASS + CODE_SIZE * NUM_CLASS]
    return cls_preds, reg_preds


# =====================================================================================
# Plain-JAX glue (shape plumbing / box geometry / selection), matching the PyTorch module.
# =====================================================================================
def rotate_points_along_z(points, angle):
    # points: (B, N, 3+C), angle: (B,)  -- same math as common_utils.rotate_points_along_z
    cosa, sina = jnp.cos(angle), jnp.sin(angle)
    zeros, ones = jnp.zeros_like(cosa), jnp.ones_like(cosa)
    rot = jnp.stack([cosa, sina, zeros,
                     -sina, cosa, zeros,
                     zeros, zeros, ones], axis=1).reshape(-1, 3, 3)
    xyz = jnp.einsum('bnd,bde->bne', points[..., :3], rot)
    return jnp.concatenate([xyz, points[..., 3:]], axis=-1)


def decode_boxes(encodings, anchors):
    # ResidualCoder_v1.decode_torch
    xa, ya, za, dxa, dya, dza, ra = jnp.split(anchors, 7, axis=-1)
    xt, yt, zt, dxt, dyt, dzt, rt = jnp.split(encodings, 7, axis=-1)
    diag = jnp.sqrt(dxa ** 2 + dya ** 2)
    xg = xt * diag + xa
    yg = yt * diag + ya
    zg = zt * dza + za
    dxg = jnp.exp(dxt) * dxa
    dyg = jnp.exp(dyt) * dya
    dzg = jnp.exp(dzt) * dza
    rg = rt + ra
    return jnp.concatenate([xg, yg, zg, dxg, dyg, dzg, rg], axis=-1)


def proposal_layer(rpn_box_preds, rpn_cls_preds):
    # TODO(synk): iou3d_nms_utils.nms_gpu (rotated 3D NMS) has no clean Pallas equivalent;
    #             proposal selection here is pure per-batch top-k by max class score.
    roi_score_all = jnp.max(rpn_cls_preds, axis=-1)
    roi_label_all = jnp.argmax(rpn_cls_preds, axis=-1)
    scores, idx = jax.lax.top_k(roi_score_all, NMS_POST_MAXSIZE)
    rois = jnp.take_along_axis(rpn_box_preds, idx[..., None], axis=1)
    labels = jnp.take_along_axis(roi_label_all, idx, axis=1) + 1
    return rois, scores, labels


def roi_grid_points(rois):
    # rois: (B, R, 7) -> global grid points (B, R*G3, 3); grid index is the fast axis.
    B, R, _ = rois.shape
    rois_f = rois.reshape(-1, 7)
    gi, gj, gk = jnp.meshgrid(jnp.arange(GRID_SIZE), jnp.arange(GRID_SIZE),
                              jnp.arange(GRID_SIZE), indexing='ij')
    local_id = jnp.stack([gi, gj, gk], axis=-1).reshape(-1, 3).astype(jnp.float32)  # (G3, 3)
    size = rois_f[:, None, 3:6]
    pts = (local_id[None] + 0.5) * (size / GRID_SIZE) - size / 2.0
    pts = rotate_points_along_z(pts, rois_f[:, 6])
    pts = pts + rois_f[:, None, 0:3]
    return pts.reshape(B, R * G3, 3)


def ball_group(points_xyz, points_feat, new_xyz, radius, nsample):
    # TODO(synk): exact stack ball_query CUDA op; approximated with first-in-radius top-k gather.
    d2 = jnp.sum((new_xyz[:, :, None, :] - points_xyz[:, None, :, :]) ** 2, axis=-1)  # (B,Q,P)
    within = d2 < radius ** 2
    P = points_xyz.shape[1]
    # integer ranking keys -> exact first-in-radius ordering for any realistic point count
    neg_idx = -jnp.arange(P, dtype=jnp.int32)
    sentinel = jnp.iinfo(jnp.int32).min
    order = jnp.where(within, neg_idx[None, None, :], sentinel)
    vals, idx = jax.lax.top_k(order, nsample)
    valid = vals > sentinel
    nonempty = valid[..., 0]
    idx = jnp.where(valid, idx, idx[..., 0:1])        # duplicate first found (max-pool invariant)
    gather = jax.vmap(lambda arr, ix: arr[ix])
    g_xyz = gather(points_xyz, idx)                   # (B, Q, ns, 3)
    g_feat = gather(points_feat, idx)                 # (B, Q, ns, C)
    rel = g_xyz - new_xyz[:, :, None, :]              # use_xyz=True -> relative coords first
    return rel, g_feat, nonempty


def rcnn_forward(batch_dict, params):
    """Eval-mode forward of RCNNnet (proposal -> roi grid pool -> shared/cls/reg head -> decode)."""
    rois, roi_scores, roi_labels = proposal_layer(batch_dict['rpn_box_preds'],
                                                  batch_dict['rpn_cls_preds'])
    B = rois.shape[0]
    P = batch_dict['points_per_batch']
    R_per_b = NMS_POST_MAXSIZE
    NS = NSAMPLE[0]

    # --- roi_grid_pool_layer inputs ---
    pf = batch_dict['point_features'] * batch_dict['point_cls_scores'][:, None]
    xyz = batch_dict['point_coords'][:, 1:4].reshape(B, P, 3)
    feat = pf.reshape(B, P, CHANNEL_IN)
    new_xyz = roi_grid_points(rois)                   # (B, Q, 3), Q = R_per_b*G3

    # --- grouped slab built directly in its final branch-merged, K-padded layout:
    #     one concatenate -> one transpose -> (NS, N_roi, G3*2*DIN_PAD) bf16 ---
    parts, ne_list = [], []
    for br in range(len(POOL_RADIUS)):
        rel, g_feat, nonempty = ball_group(xyz, feat, new_xyz, POOL_RADIUS[br], NSAMPLE[br])
        parts += [rel, g_feat, jnp.zeros(rel.shape[:-1] + (DIN_PAD - DIN,), rel.dtype)]
        ne_list.append(nonempty)
    grp = jnp.concatenate(parts, axis=-1)                            # (B, Q, NS, 2*DIN_PAD)
    grp = grp.reshape(B, R_per_b, G3, NS, 2 * DIN_PAD)
    grp = jnp.transpose(grp, (3, 0, 1, 2, 4))                        # (NS, B, R_per_b, G3, 16)
    grp = grp.reshape(NS, B * R_per_b, KW).astype(jnp.bfloat16)      # (NS, N_roi, 128)

    # full-width lane mask for empty-ball zeroing: (N_roi, G3*POOL_OUT) matching pooled columns
    ne = jnp.stack(ne_list, axis=-1).astype(jnp.float32)             # (B, Q, 2)
    ne = ne.reshape(B, R_per_b, G3, 2)
    mask = jnp.repeat(ne, C_OUT0, axis=-1).reshape(B * R_per_b, G3 * POOL_OUT)

    # --- single fused Pallas kernel: pool (MLP+max) + share/cls/reg head ---
    cls_preds, reg_preds = fused_pool_head(grp, mask, params['fused'])

    # --- generate_predict_box (eval branch) ---
    cls_preds_b = cls_preds.reshape(B, -1, NUM_CLASS)
    reg_preds_b = reg_preds.reshape(B, -1, CODE_SIZE)
    rois_temp = rois.at[..., 0:3].set(0.0)
    box_ct = decode_boxes(reg_preds_b, rois_temp).reshape(-1, CODE_SIZE)
    box_preds = rotate_points_along_z(box_ct[:, None, :], rois[..., 6].reshape(-1))[:, 0, :]
    box_preds = box_preds.reshape(B, -1, CODE_SIZE)
    box_preds = box_preds.at[..., 0:3].add(rois[..., 0:3])

    # TODO(synk): training path (GenerateStageTwoTargets, Weighted losses, dropout) not implemented.
    return {'rois': rois, 'roi_scores': roi_scores, 'roi_labels': roi_labels,
            'rcnn_cls_preds': cls_preds_b, 'rcnn_box_preds': box_preds}


# =====================================================================================
# Deterministic parameter construction (shapes follow RCNNnet.__init__ / init_weights),
# with eval-mode BatchNorm folded into the conv weights/biases, the pool MLP expanded to
# an 8x block-diagonal (128, 256), and the pool->head permutation folded into w1.
# =====================================================================================
def xavier(key, fan_in, fan_out):
    std = (2.0 / (fan_in + fan_out)) ** 0.5
    return (std * jax.random.normal(key, (fan_in, fan_out))).astype(jnp.float32)


def bn_params(key, c):
    k1, k2, k3, k4 = jax.random.split(key, 4)
    gamma = 1.0 + 0.1 * jax.random.normal(k1, (c,))
    beta = 0.1 * jax.random.normal(k2, (c,))
    mean = 0.1 * jax.random.normal(k3, (c,))
    var = jnp.abs(1.0 + 0.1 * jax.random.normal(k4, (c,)))
    return jnp.stack([gamma, beta, mean, var]).astype(jnp.float32)


def fold_bn(w, bn):
    # eval-mode BN:  y = (x@w - mean) * gamma/sqrt(var+eps) + beta  ==  x@(w*s) + (beta - mean*s)
    gamma, beta, mean, var = bn[0], bn[1], bn[2], bn[3]
    scale = gamma / jnp.sqrt(var + BN_EPS)
    return (w * scale[None, :]).astype(jnp.float32), (beta - mean * scale)[None, :].astype(jnp.float32)


def init_params(key):
    ks = iter(jax.random.split(key, 32))

    # --- pooling MLPs (Conv2d k=1 + BN folded), 2-branch unit block ---
    w_br, b_br = [], []
    for m in MLPS:
        c = m[-1]
        w = xavier(next(ks), DIN, c)
        w = jnp.concatenate([w, jnp.zeros((DIN_PAD - DIN, c), jnp.float32)], axis=0)  # pad K row
        wf_, bf_ = fold_bn(w, bn_params(next(ks), c))
        w_br.append(wf_)
        b_br.append(bf_)
    w_unit = jnp.zeros((2 * DIN_PAD, POOL_OUT), jnp.float32)
    w_unit = w_unit.at[:DIN_PAD, :C_OUT0].set(w_br[0])
    w_unit = w_unit.at[DIN_PAD:, C_OUT0:].set(w_br[1])
    # 8x (one per ROI grid point) block-diagonal pool weight: (128, 256)
    pool_w = jnp.zeros((KW, G3 * POOL_OUT), jnp.float32)
    for g in range(G3):
        pool_w = pool_w.at[g * 2 * DIN_PAD:(g + 1) * 2 * DIN_PAD,
                           g * POOL_OUT:(g + 1) * POOL_OUT].set(w_unit)
    pool_b = jnp.tile(jnp.concatenate(b_br, axis=1), (1, G3))        # (1, 256)

    # --- shared FC layers (Conv1d k=1 + BN folded).  w1's rows are re-ordered from the PyTorch
    #     channel-major pooled layout (c*G3+g, from view().permute(0,2,1)) to our grid-major
    #     layout (g*POOL_OUT+c), folding the permute into the weight. ---
    w1 = xavier(next(ks), PRE_CHANNEL, SHARED_FC[0])
    w1, b1 = fold_bn(w1, bn_params(next(ks), SHARED_FC[0]))
    perm = (jnp.arange(POOL_OUT)[None, :] * G3 + jnp.arange(G3)[:, None]).reshape(-1)  # [g*32+c] -> c*8+g
    w1 = w1[perm]
    w2 = xavier(next(ks), SHARED_FC[0], SHARED_FC[1])
    w2, b2 = fold_bn(w2, bn_params(next(ks), SHARED_FC[1]))

    # --- cls/reg hidden layers merged into one (128, 256) matmul ---
    wc1 = xavier(next(ks), SHARED_FC[1], CLS_FC[0]); wc1, bc1 = fold_bn(wc1, bn_params(next(ks), CLS_FC[0]))
    wr1 = xavier(next(ks), SHARED_FC[1], REG_FC[0]); wr1, br1 = fold_bn(wr1, bn_params(next(ks), REG_FC[0]))
    wcr = jnp.concatenate([wc1, wr1], axis=1)             # (128, 256)
    bcr = jnp.concatenate([bc1, br1], axis=1)             # (1, 256)

    # --- final cls/reg layers merged into one lane-dense 128-wide padded block (kept f32) ---
    wc2 = xavier(next(ks), CLS_FC[0], NUM_CLASS)
    wr2 = (0.001 * jax.random.normal(next(ks), (REG_FC[0], CODE_SIZE * NUM_CLASS))).astype(jnp.float32)
    wf = jnp.zeros((CLS_FC[0] + REG_FC[0], PAD), jnp.float32)
    wf = wf.at[:CLS_FC[0], :NUM_CLASS].set(wc2)
    wf = wf.at[CLS_FC[0]:, NUM_CLASS:NUM_CLASS + CODE_SIZE * NUM_CLASS].set(wr2)
    bf = jnp.zeros((1, PAD), jnp.float32)                 # conv bias init constant_(0)

    bf16 = jnp.bfloat16
    fused = (pool_w.astype(bf16), pool_b,
             w1.astype(bf16), b1,
             w2.astype(bf16), b2,
             wcr.astype(bf16), bcr,
             wf, bf)
    return {'fused': fused}


if __name__ == "__main__":
    B = 2          # batch_size
    A = 256        # num anchors (rpn proposals per batch)
    P = 128        # points per batch

    key = jax.random.PRNGKey(0)
    kc, kd, ky, kcls, kxyz, kfeat, kscore = jax.random.split(key, 7)
    centers = jax.random.uniform(kc, (B, A, 3), minval=-3.0, maxval=3.0)
    dims = jax.random.uniform(kd, (B, A, 3), minval=1.0, maxval=3.0)
    yaw = jax.random.uniform(ky, (B, A, 1), minval=-3.14, maxval=3.14)
    rpn_box_preds = jnp.concatenate([centers, dims, yaw], axis=-1).astype(jnp.float32)
    rpn_cls_preds = jax.random.normal(kcls, (B, A, NUM_CLASS), jnp.float32)

    batch_idx = jnp.repeat(jnp.arange(B, dtype=jnp.float32), P)[:, None]
    pts_xyz = jax.random.uniform(kxyz, (B * P, 3), minval=-3.0, maxval=3.0)
    point_coords = jnp.concatenate([batch_idx, pts_xyz], axis=-1).astype(jnp.float32)
    point_features = jax.random.normal(kfeat, (B * P, CHANNEL_IN), jnp.float32)
    point_cls_scores = jax.nn.sigmoid(jax.random.normal(kscore, (B * P,), jnp.float32))

    batch_dict = {
        'batch_size': B,
        'rpn_box_preds': rpn_box_preds,
        'rpn_cls_preds': rpn_cls_preds,
        'point_coords': point_coords,
        'point_features': point_features,
        'point_cls_scores': point_cls_scores,
        'points_per_batch': P,
    }

    params = init_params(jax.random.PRNGKey(1))
    out = rcnn_forward(batch_dict, params)
    jax.block_until_ready(out)
    assert out['rcnn_cls_preds'].shape == (B, NMS_POST_MAXSIZE, NUM_CLASS)
    assert out['rcnn_box_preds'].shape == (B, NMS_POST_MAXSIZE, CODE_SIZE)
    assert bool(jnp.all(jnp.isfinite(out['rcnn_box_preds'])))
    print("KERNEL_OK")
</pallas_src>

<mosaic_0001>
module attributes {stable_mosaic.version = 11 : i64} {
  func.func @fused_pool_head_kernel(%arg0: i32, %arg1: memref<16x64x128xbf16, #tpu.memory_space<vmem>>, %arg2: memref<64x256xf32, #tpu.memory_space<vmem>>, %arg3: memref<128x256xbf16, #tpu.memory_space<vmem>>, %arg4: memref<1x256xf32, #tpu.memory_space<vmem>>, %arg5: memref<256x128xbf16, #tpu.memory_space<vmem>>, %arg6: memref<1x128xf32, #tpu.memory_space<vmem>>, %arg7: memref<128x128xbf16, #tpu.memory_space<vmem>>, %arg8: memref<1x128xf32, #tpu.memory_space<vmem>>, %arg9: memref<128x256xbf16, #tpu.memory_space<vmem>>, %arg10: memref<1x256xf32, #tpu.memory_space<vmem>>, %arg11: memref<256x128xf32, #tpu.memory_space<vmem>>, %arg12: memref<1x128xf32, #tpu.memory_space<vmem>>, %arg13: memref<64x128xf32, #tpu.memory_space<vmem>>) attributes {dimension_semantics = [#tpu.dimension_semantics<parallel>], iteration_bounds = array<i64: 2>, scalar_prefetch = 0 : i64, scratch_operands = 0 : i64, tpu.core_type = #tpu.core_type<tc>, window_params = [{transform_indices = @transform_0, window_bounds = array<i64: 16, 64, 128>}, {transform_indices = @transform_1, window_bounds = array<i64: 64, 256>}, {pipeline_mode = #tpu.pipeline_mode<synchronous>, transform_indices = @transform_2, window_bounds = array<i64: 128, 256>}, {pipeline_mode = #tpu.pipeline_mode<synchronous>, transform_indices = @transform_3, window_bounds = array<i64: 1, 256>}, {pipeline_mode = #tpu.pipeline_mode<synchronous>, transform_indices = @transform_4, window_bounds = array<i64: 256, 128>}, {pipeline_mode = #tpu.pipeline_mode<synchronous>, transform_indices = @transform_5, window_bounds = array<i64: 1, 128>}, {pipeline_mode = #tpu.pipeline_mode<synchronous>, transform_indices = @transform_6, window_bounds = array<i64: 128, 128>}, {pipeline_mode = #tpu.pipeline_mode<synchronous>, transform_indices = @transform_7, window_bounds = array<i64: 1, 128>}, {pipeline_mode = #tpu.pipeline_mode<synchronous>, transform_indices = @transform_8, window_bounds = array<i64: 128, 256>}, {pipeline_mode = #tpu.pipeline_mode<synchronous>, transform_indices = @transform_9, window_bounds = array<i64: 1, 256>}, {pipeline_mode = #tpu.pipeline_mode<synchronous>, transform_indices = @transform_10, window_bounds = array<i64: 256, 128>}, {pipeline_mode = #tpu.pipeline_mode<synchronous>, transform_indices = @transform_11, window_bounds = array<i64: 1, 128>}, {transform_indices = @transform_12, window_bounds = array<i64: 64, 128>}]} {
    %c0 = arith.constant 0 : index
    %c0_0 = arith.constant 0 : index
    %c0_1 = arith.constant 0 : index
    %0 = vector.load %arg1[%c0, %c0_0, %c0_1] : memref<16x64x128xbf16, #tpu.memory_space<vmem>>, vector<16x64x128xbf16>
    %1 = vector.shape_cast %0 : vector<16x64x128xbf16> to vector<1024x128xbf16>
    %c0_2 = arith.constant 0 : index
    %c0_3 = arith.constant 0 : index
    %2 = vector.load %arg3[%c0_2, %c0_3] : memref<128x256xbf16, #tpu.memory_space<vmem>>, vector<128x256xbf16>
    %cst = arith.constant dense<0.000000e+00> : vector<1024x256xf32>
    %3 = tpu.matmul %1, %2, %cst {dimension_numbers = #tpu.dot_dimension_numbers<[1], [0], [0], [1], [0, 0, 1, 1], [], []>} : vector<1024x128xbf16>, vector<128x256xbf16>, vector<1024x256xf32> -> vector<1024x256xf32>
    %4 = vector.shape_cast %3 : vector<1024x256xf32> to vector<16x64x256xf32>
    %5 = vector.extract_strided_slice %4 {offsets = [0, 0, 0], sizes = [1, 64, 256], strides = [1, 1, 1]} : vector<16x64x256xf32> to vector<1x64x256xf32>
    %6 = vector.shape_cast %5 : vector<1x64x256xf32> to vector<64x256xf32>
    %7 = vector.extract_strided_slice %4 {offsets = [1, 0, 0], sizes = [1, 64, 256], strides = [1, 1, 1]} : vector<16x64x256xf32> to vector<1x64x256xf32>
    %8 = vector.shape_cast %7 : vector<1x64x256xf32> to vector<64x256xf32>
    %9 = arith.maximumf %6, %8 : vector<64x256xf32>
    %10 = vector.extract_strided_slice %4 {offsets = [2, 0, 0], sizes = [1, 64, 256], strides = [1, 1, 1]} : vector<16x64x256xf32> to vector<1x64x256xf32>
    %11 = vector.shape_cast %10 : vector<1x64x256xf32> to vector<64x256xf32>
    %12 = arith.maximumf %9, %11 : vector<64x256xf32>
    %13 = vector.extract_strided_slice %4 {offsets = [3, 0, 0], sizes = [1, 64, 256], strides = [1, 1, 1]} : vector<16x64x256xf32> to vector<1x64x256xf32>
    %14 = vector.shape_cast %13 : vector<1x64x256xf32> to vector<64x256xf32>
    %15 = arith.maximumf %12, %14 : vector<64x256xf32>
    %16 = vector.extract_strided_slice %4 {offsets = [4, 0, 0], sizes = [1, 64, 256], strides = [1, 1, 1]} : vector<16x64x256xf32> to vector<1x64x256xf32>
    %17 = vector.shape_cast %16 : vector<1x64x256xf32> to vector<64x256xf32>
    %18 = arith.maximumf %15, %17 : vector<64x256xf32>
    %19 = vector.extract_strided_slice %4 {offsets = [5, 0, 0], sizes = [1, 64, 256], strides = [1, 1, 1]} : vector<16x64x256xf32> to vector<1x64x256xf32>
    %20 = vector.shape_cast %19 : vector<1x64x256xf32> to vector<64x256xf32>
    %21 = arith.maximumf %18, %20 : vector<64x256xf32>
    %22 = vector.extract_strided_slice %4 {offsets = [6, 0, 0], sizes = [1, 64, 256], strides = [1, 1, 1]} : vector<16x64x256xf32> to vector<1x64x256xf32>
    %23 = vector.shape_cast %22 : vector<1x64x256xf32> to vector<64x256xf32>
    %24 = arith.maximumf %21, %23 : vector<64x256xf32>
    %25 = vector.extract_strided_slice %4 {offsets = [7, 0, 0], sizes = [1, 64, 256], strides = [1, 1, 1]} : vector<16x64x256xf32> to vector<1x64x256xf32>
    %26 = vector.shape_cast %25 : vector<1x64x256xf32> to vector<64x256xf32>
    %27 = arith.maximumf %24, %26 : vector<64x256xf32>
    %28 = vector.extract_strided_slice %4 {offsets = [8, 0, 0], sizes = [1, 64, 256], strides = [1, 1, 1]} : vector<16x64x256xf32> to vector<1x64x256xf32>
    %29 = vector.shape_cast %28 : vector<1x64x256xf32> to vector<64x256xf32>
    %30 = arith.maximumf %27, %29 : vector<64x256xf32>
    %31 = vector.extract_strided_slice %4 {offsets = [9, 0, 0], sizes = [1, 64, 256], strides = [1, 1, 1]} : vector<16x64x256xf32> to vector<1x64x256xf32>
    %32 = vector.shape_cast %31 : vector<1x64x256xf32> to vector<64x256xf32>
    %33 = arith.maximumf %30, %32 : vector<64x256xf32>
    %34 = vector.extract_strided_slice %4 {offsets = [10, 0, 0], sizes = [1, 64, 256], strides = [1, 1, 1]} : vector<16x64x256xf32> to vector<1x64x256xf32>
    %35 = vector.shape_cast %34 : vector<1x64x256xf32> to vector<64x256xf32>
    %36 = arith.maximumf %33, %35 : vector<64x256xf32>
    %37 = vector.extract_strided_slice %4 {offsets = [11, 0, 0], sizes = [1, 64, 256], strides = [1, 1, 1]} : vector<16x64x256xf32> to vector<1x64x256xf32>
    %38 = vector.shape_cast %37 : vector<1x64x256xf32> to vector<64x256xf32>
    %39 = arith.maximumf %36, %38 : vector<64x256xf32>
    %40 = vector.extract_strided_slice %4 {offsets = [12, 0, 0], sizes = [1, 64, 256], strides = [1, 1, 1]} : vector<16x64x256xf32> to vector<1x64x256xf32>
    %41 = vector.shape_cast %40 : vector<1x64x256xf32> to vector<64x256xf32>
    %42 = arith.maximumf %39, %41 : vector<64x256xf32>
    %43 = vector.extract_strided_slice %4 {offsets = [13, 0, 0], sizes = [1, 64, 256], strides = [1, 1, 1]} : vector<16x64x256xf32> to vector<1x64x256xf32>
    %44 = vector.shape_cast %43 : vector<1x64x256xf32> to vector<64x256xf32>
    %45 = arith.maximumf %42, %44 : vector<64x256xf32>
    %46 = vector.extract_strided_slice %4 {offsets = [14, 0, 0], sizes = [1, 64, 256], strides = [1, 1, 1]} : vector<16x64x256xf32> to vector<1x64x256xf32>
    %47 = vector.shape_cast %46 : vector<1x64x256xf32> to vector<64x256xf32>
    %48 = arith.maximumf %45, %47 : vector<64x256xf32>
    %49 = vector.extract_strided_slice %4 {offsets = [15, 0, 0], sizes = [1, 64, 256], strides = [1, 1, 1]} : vector<16x64x256xf32> to vector<1x64x256xf32>
    %50 = vector.shape_cast %49 : vector<1x64x256xf32> to vector<64x256xf32>
    %51 = arith.maximumf %48, %50 : vector<64x256xf32>
    %c0_4 = arith.constant 0 : index
    %c0_5 = arith.constant 0 : index
    %52 = vector.load %arg4[%c0_4, %c0_5] : memref<1x256xf32, #tpu.memory_space<vmem>>, vector<1x256xf32>
    %53 = vector.broadcast %52 : vector<1x256xf32> to vector<64x256xf32>
    %54 = arith.addf %51, %53 : vector<64x256xf32>
    %cst_6 = arith.constant 0.000000e+00 : f32
    %55 = vector.broadcast %cst_6 : f32 to vector<64x256xf32>
    %56 = arith.maximumf %54, %55 : vector<64x256xf32>
    %c0_7 = arith.constant 0 : index
    %c0_8 = arith.constant 0 : index
    %57 = vector.load %arg2[%c0_7, %c0_8] : memref<64x256xf32, #tpu.memory_space<vmem>>, vector<64x256xf32>
    %58 = arith.mulf %56, %57 : vector<64x256xf32>
    %59 = arith.truncf %58 : vector<64x256xf32> to vector<64x256xbf16>
    %c0_9 = arith.constant 0 : index
    %c0_10 = arith.constant 0 : index
    %60 = vector.load %arg5[%c0_9, %c0_10] : memref<256x128xbf16, #tpu.memory_space<vmem>>, vector<256x128xbf16>
    %cst_11 = arith.constant dense<0.000000e+00> : vector<64x128xf32>
    %61 = tpu.matmul %59, %60, %cst_11 {dimension_numbers = #tpu.dot_dimension_numbers<[1], [0], [0], [1], [0, 0, 1, 1], [], []>} : vector<64x256xbf16>, vector<256x128xbf16>, vector<64x128xf32> -> vector<64x128xf32>
    %c0_12 = arith.constant 0 : index
    %c0_13 = arith.constant 0 : index
    %62 = vector.load %arg6[%c0_12, %c0_13] : memref<1x128xf32, #tpu.memory_space<vmem>>, vector<1x128xf32>
    %63 = vector.broadcast %62 : vector<1x128xf32> to vector<64x128xf32>
    %64 = arith.addf %61, %63 : vector<64x128xf32>
    %cst_14 = arith.constant 0.000000e+00 : f32
    %65 = vector.broadcast %cst_14 : f32 to vector<64x128xf32>
    %66 = arith.maximumf %64, %65 : vector<64x128xf32>
    %67 = arith.truncf %66 : vector<64x128xf32> to vector<64x128xbf16>
    %c0_15 = arith.constant 0 : index
    %c0_16 = arith.constant 0 : index
    %68 = vector.load %arg7[%c0_15, %c0_16] : memref<128x128xbf16, #tpu.memory_space<vmem>>, vector<128x128xbf16>
    %cst_17 = arith.constant dense<0.000000e+00> : vector<64x128xf32>
    %69 = tpu.matmul %67, %68, %cst_17 {dimension_numbers = #tpu.dot_dimension_numbers<[1], [0], [0], [1], [0, 0, 1, 1], [], []>} : vector<64x128xbf16>, vector<128x128xbf16>, vector<64x128xf32> -> vector<64x128xf32>
    %c0_18 = arith.constant 0 : index
    %c0_19 = arith.constant 0 : index
    %70 = vector.load %arg8[%c0_18, %c0_19] : memref<1x128xf32, #tpu.memory_space<vmem>>, vector<1x128xf32>
    %71 = vector.broadcast %70 : vector<1x128xf32> to vector<64x128xf32>
    %72 = arith.addf %69, %71 : vector<64x128xf32>
    %cst_20 = arith.constant 0.000000e+00 : f32
    %73 = vector.broadcast %cst_20 : f32 to vector<64x128xf32>
    %74 = arith.maximumf %72, %73 : vector<64x128xf32>
    %75 = arith.truncf %74 : vector<64x128xf32> to vector<64x128xbf16>
    %c0_21 = arith.constant 0 : index
    %c0_22 = arith.constant 0 : index
    %76 = vector.load %arg9[%c0_21, %c0_22] : memref<128x256xbf16, #tpu.memory_space<vmem>>, vector<128x256xbf16>
    %cst_23 = arith.constant dense<0.000000e+00> : vector<64x256xf32>
    %77 = tpu.matmul %75, %76, %cst_23 {dimension_numbers = #tpu.dot_dimension_numbers<[1], [0], [0], [1], [0, 0, 1, 1], [], []>} : vector<64x128xbf16>, vector<128x256xbf16>, vector<64x256xf32> -> vector<64x256xf32>
    %c0_24 = arith.constant 0 : index
    %c0_25 = arith.constant 0 : index
    %78 = vector.load %arg10[%c0_24, %c0_25] : memref<1x256xf32, #tpu.memory_space<vmem>>, vector<1x256xf32>
    %79 = vector.broadcast %78 : vector<1x256xf32> to vector<64x256xf32>
    %80 = arith.addf %77, %79 : vector<64x256xf32>
    %cst_26 = arith.constant 0.000000e+00 : f32
    %81 = vector.broadcast %cst_26 : f32 to vector<64x256xf32>
    %82 = arith.maximumf %80, %81 : vector<64x256xf32>
    %c0_27 = arith.constant 0 : index
    %c0_28 = arith.constant 0 : index
    %83 = vector.load %arg11[%c0_27, %c0_28] : memref<256x128xf32, #tpu.memory_space<vmem>>, vector<256x128xf32>
    %cst_29 = arith.constant dense<0.000000e+00> : vector<64x128xf32>
    %84 = tpu.matmul %82, %83, %cst_29 {dimension_numbers = #tpu.dot_dimension_numbers<[1], [0], [0], [1], [0, 0, 1, 1], [], []>} : vector<64x256xf32>, vector<256x128xf32>, vector<64x128xf32> -> vector<64x128xf32>
    %c0_30 = arith.constant 0 : index
    %c0_31 = arith.constant 0 : index
    %85 = vector.load %arg12[%c0_30, %c0_31] : memref<1x128xf32, #tpu.memory_space<vmem>>, vector<1x128xf32>
    %86 = vector.broadcast %85 : vector<1x128xf32> to vector<64x128xf32>
    %87 = arith.addf %84, %86 : vector<64x128xf32>
    %c0_32 = arith.constant 0 : index
    %c0_33 = arith.constant 0 : index
    %88 = vector.load %arg13[%c0_32, %c0_33] : memref<64x128xf32, #tpu.memory_space<vmem>>, vector<64x128xf32>
    tpu.vector_store %arg13[%c0_32, %c0_33], %87 {strides = array<i32>} : memref<64x128xf32, #tpu.memory_space<vmem>>, vector<64x128xf32>,
    return
  }
  func.func @transform_0(%arg0: i32) -> (i32, i32, i32) {
    %c0_i32 = arith.constant 0 : i32
    %c0_i32_0 = arith.constant 0 : i32
    %c0_i32_1 = arith.constant 0 : i32
    return %c0_i32, %arg0, %c0_i32_0 : i32, i32, i32
  }
  func.func @transform_1(%arg0: i32) -> (i32, i32) {
    %c0_i32 = arith.constant 0 : i32
    %c0_i32_0 = arith.constant 0 : i32
    return %arg0, %c0_i32 : i32, i32
  }
  func.func @transform_2(%arg0: i32) -> (i32, i32) {
    %c0_i32 = arith.constant 0 : i32
    %c0_i32_0 = arith.constant 0 : i32
    %c0_i32_1 = arith.constant 0 : i32
    return %c0_i32, %c0_i32_0 : i32, i32
  }
  func.func @transform_3(%arg0: i32) -> (i32, i32) {
    %c0_i32 = arith.constant 0 : i32
    %c0_i32_0 = arith.constant 0 : i32
    %c0_i32_1 = arith.constant 0 : i32
    return %c0_i32, %c0_i32_0 : i32, i32
  }
  func.func @transform_4(%arg0: i32) -> (i32, i32) {
    %c0_i32 = arith.constant 0 : i32
    %c0_i32_0 = arith.constant 0 : i32
    %c0_i32_1 = arith.constant 0 : i32
    return %c0_i32, %c0_i32_0 : i32, i32
  }
  func.func @transform_5(%arg0: i32) -> (i32, i32) {
    %c0_i32 = arith.constant 0 : i32
    %c0_i32_0 = arith.constant 0 : i32
    %c0_i32_1 = arith.constant 0 : i32
    return %c0_i32, %c0_i32_0 : i32, i32
  }
  func.func @transform_6(%arg0: i32) -> (i32, i32) {
    %c0_i32 = arith.constant 0 : i32
    %c0_i32_0 = arith.constant 0 : i32
    %c0_i32_1 = arith.constant 0 : i32
    return %c0_i32, %c0_i32_0 : i32, i32
  }
  func.func @transform_7(%arg0: i32) -> (i32, i32) {
    %c0_i32 = arith.constant 0 : i32
    %c0_i32_0 = arith.constant 0 : i32
    %c0_i32_1 = arith.constant 0 : i32
    return %c0_i32, %c0_i32_0 : i32, i32
  }
  func.func @transform_8(%arg0: i32) -> (i32, i32) {
    %c0_i32 = arith.constant 0 : i32
    %c0_i32_0 = arith.constant 0 : i32
    %c0_i32_1 = arith.constant 0 : i32
    return %c0_i32, %c0_i32_0 : i32, i32
  }
  func.func @transform_9(%arg0: i32) -> (i32, i32) {
    %c0_i32 = arith.constant 0 : i32
    %c0_i32_0 = arith.constant 0 : i32
    %c0_i32_1 = arith.constant 0 : i32
    return %c0_i32, %c0_i32_0 : i32, i32
  }
  func.func @transform_10(%arg0: i32) -> (i32, i32) {
    %c0_i32 = arith.constant 0 : i32
    %c0_i32_0 = arith.constant 0 : i32
    %c0_i32_1 = arith.constant 0 : i32
    return %c0_i32, %c0_i32_0 : i32, i32
  }
  func.func @transform_11(%arg0: i32) -> (i32, i32) {
    %c0_i32 = arith.constant 0 : i32
    %c0_i32_0 = arith.constant 0 : i32
    %c0_i32_1 = arith.constant 0 : i32
    return %c0_i32, %c0_i32_0 : i32, i32
  }
  func.func @transform_12(%arg0: i32) -> (i32, i32) {
    %c0_i32 = arith.constant 0 : i32
    %c0_i32_0 = arith.constant 0 : i32
    return %arg0, %c0_i32 : i32, i32
  }
}

</mosaic_0001>

<bundles_post_ra>
// kernel: tpu_custom_call.1
= control target key start
LH: loop header
LB: loop body
LE: loop exit
PB: predicated region body
PF: predicated region fallthrough
CT: control target
= control target key end

     0   :  { %s5153_s0 = inlined_call_operand.hbm [shape: bf16[16,128,128], index: 0, kind: input, shape index: {}]   ;;  %s5154_s1 = inlined_call_operand.hbm [shape: f32[128,256], index: 1, kind: input, shape index: {}]   ;;  %s5155_s2 = inlined_call_operand.hbm [shape: bf16[128,256], index: 2, kind: input, shape index: {}]   ;;  %s5156_s3 = inlined_call_operand.vmem [shape: f32[1,256], index: 3, kind: input, shape index: {}]   ;;  %s5157_s4 = inlined_call_operand.hbm [shape: bf16[256,128], index: 4, kind: input, shape index: {}]   ;;  %s5158_s5 = inlined_call_operand.vmem [shape: f32[1,128], index: 5, kind: input, shape index: {}]   ;;  %s5159_s6 = inlined_call_operand.hbm [shape: bf16[128,128], index: 6, kind: input, shape index: {}]   ;;  %s5160_s7 = inlined_call_operand.vmem [shape: f32[1,128], index: 7, kind: input, shape index: {}]   ;;  %s5161_s8 = inlined_call_operand.hbm [shape: bf16[128,256], index: 8, kind: input, shape index: {}]   ;;  %s5162_s9 = inlined_call_operand.vmem [shape: f32[1,256], index: 9, kind: input, shape index: {}]   ;;  %s5163_s10 = inlined_call_operand.hbm [shape: f32[256,128], index: 10, kind: input, shape index: {}]   ;;  %s5164_s11 = inlined_call_operand.vmem [shape: f32[1,128], index: 11, kind: input, shape index: {}]   ;;  %s5165_s12 = inlined_call_operand.hbm [shape: f32[128,128], index: 12, kind: output, shape index: {}]  }
   0x1   :  { %5186 = sst [smem:[#allocation72_spill]] %s5156_s3 }
   0x2   :  { %5187 = sst [smem:[#allocation73_spill]] %s5157_s4 }
   0x3   :  { %5188 = sst [smem:[#allocation74_spill]] %s5158_s5 }
   0x4   :  { %5189 = sst [smem:[#allocation75_spill]] %s5160_s7 }
   0x5   :  { %5190 = sst [smem:[#allocation76_spill]] %s5162_s9 }
   0x6   :  { %5191 = sst [smem:[#allocation77_spill]] %s5164_s11 }
   0x7   :  { %5192 = sst [smem:[#allocation78_spill]] %s5165_s12 }
   0x8   :  { %17 = vsyncpa [#allocation3], 0 }
   0x9   :  { %19 = vsyncpa [#allocation3 + $0x1], 0 }
   0xa   :  { %20 = vsyncpa [#allocation6], 0 }
   0xb   :  { %22 = vsyncpa [#allocation6 + $0x1], 0 }
   0xc   :  { %23 = vsyncpa [#allocation9], 0 }
   0xd   :  { %24 = vsyncpa [#allocation12], 0 }
   0xe   :  { %25 = vsyncpa [#allocation4], 0 }
   0xf   :  { %27 = vsyncpa [#allocation4 + $0x1], 0  ;;  %s3974_s21 = smov 0   ;;  %s3976_s22 = smov 0  }
  0x10   :  { %s3978_s23 = smov 0   ;;  %s3980_s24 = smov 0  }
  0x11 LB: > { %5193 = sst [smem:[#allocation24_spill]] %s3873_s21  ;;  %s3995_s25 = sadd.s32 4294967295, %s3885_s24   ;;  %s3885_s24 = sphi %s3980_s24, %s5343_s24   ;;  %s3881_s23 = sphi %s3978_s23, %s5347_s23   ;;  %s3877_s22 = sphi %s3976_s22, %s5346_s22   ;;  %s3873_s21 = sphi %s3974_s21, %s5345_s21  }
  0x12   : > { %s3045_s26 = sadd.s32 4294967294, %s3885_s24   ;;  %s3999_s27 = sadd.s32 1, %s3885_s24  }
  0x13   : > { %5194 = sst [smem:[#allocation25_spill]] %s3999_s27  ;;  %s40_s28 = sadd.s32 1, %s3881_s23 }
  0x14   : > { %s37_s29 = ssub.s32 %s3885_s24, %s3999_s27  ;;  %p47_p0 = scmp.ne.s32.totalorder %s3881_s23, %s3877_s22 }
  0x15   : > { %p38_p1 = scmp.eq.s32.totalorder %s37_s29, 0  ;;  %p48_p2 = scmp.eq.s32.totalorder %s3885_s24, 0 }
  0x16   : > { %p53_p3 = scmp.ne.s32.totalorder %s3877_s22, %s3873_s21  ;;  %p5173_p4 = scmp.eq.s32.totalorder %s3995_s25, 0 }
  0x17   : > { %s4011_s30 = scalar_select %p38_p1, %s3881_s23, %s40_s28  }
  0x18   : > { %p4013_p5 = por %p48_p2, %p47_p0  ;;  %p4019_p6 = por %p5173_p4, %p53_p3 }
  0x19   : > { %5195 = sst [smem:[#allocation26_spill]] %s4011_s30  ;;  %p313_p7 = scmp.eq.s32.totalorder %s3995_s25, 1 }
  0x1a   : > { %s5196_s13 = scalar_select %p4013_p5, 1, 0 }
  0x1b   : > { %s5197_s14 = scalar_select %p4019_p6, 1, 0 }
  0x1c   : > { %p319_p8 = scmp.eq.s32.totalorder %s3045_s26, 1  ;;  %p3046_p9 = scmp.ge.s32.totalorder %s3885_s24, 1 }
  0x1d   : > { %p326_p10 = scmp.lt.s32.totalorder %s3885_s24, 3  ;;  %p4026_p11 = por %p313_p7, %p47_p0 }
  0x1e   : > { %p4030_p12 = por %p319_p8, %p53_p3  ;;  %s3887_s18 = smov [#allocation8]  }
  0x1f   : > { %s5198_s15 = scalar_select %p4026_p11, 1, 0 }
  0x20   : > { %s5200_s16 = scalar_select %p4030_p12, 1, 0 }
  0x21   : > { %5199 = sst [smem:[#allocation27_spill]] %s5198_s15  ;;  %p4034_p13 = pnand %p3046_p9, %p326_p10 }
  0x22   : > { %5201 = sst [smem:[#allocation28_spill]] %s5200_s16  ;;  %s354_s19 = sshll.u32 %s3887_s18, 4  ;;  %s355_s19 = int_to_ptr.vmem [resolvable:$true] %s354_s19 }
  0x23   : > { %s5202_s17 = scalar_select %p4034_p13, 1, 0 }
  0x24   : > { %p3416_p1 = pneg %p4034_p13  ;;  %s3888_s26 = smov [#allocation11]  }
  0x25   : > { %s386_s28 = sshll.u32 %s3888_s26, 4  ;;  %s5204_s4 = sld [smem:[#allocation73_spill]]  ;;  %s387_s28 = int_to_ptr.vmem [resolvable:$true] %s386_s28 }
  0x26   : > { %p4042_p2 = pnand %p3416_p1, %p5173_p4 }
  0x28   : > { %p4054_p3 = pneg %p4042_p2 }
  0x2b   : > { %s3635_s27 = scalar_lea.hbm %s5204_s4, 2048 }
  0x2c   : > { %p3636_p0 = scmp.ne.s32.totalorder %s5204_s4, %s3635_s27  ;;  %p3642_p9 = scmp.lt.u32.totalorder %s3635_s27, %s5204_s4 }
  0x2e   : > { %p3638_p7 = pnand %p4054_p3, %p3636_p0 }
  0x30   : > { %p3639_p8 = pneg %p3638_p7 }
  0x32   : > { %p3644_p10 = pnand %p3642_p9, %p3639_p8 }
  0x34   : > { %3647 = shalt.err (!%p3644_p10)
}
  0x35   : > { %s3648_s30 = scalar_lea.vmem %s355_s19, 2048  ;;  %p3656_p11 = scmp.lt.s32.totalorder %s355_s19, %s355_s19 }
  0x36   : > { %p3649_p1 = scmp.ne.s32.totalorder %s355_s19, %s3648_s30  ;;  %p3657_p6 = scmp.lt.s32.totalorder %s3648_s30, %s3648_s30 }
  0x38   : > { %p3651_p4 = pnand %p3649_p1, %p4054_p3  ;;  %p3658_p13 = por %p3657_p6, %p3656_p11 }
  0x3a   : > { %p3652_p12 = pneg %p3651_p4 }
  0x3c   : > { %p3659_p5 = pnand %p3658_p13, %p3652_p12 }
  0x3e   : > { %3662 = shalt.err (!%p3659_p5)
}
  0x3f   : > { %s5178_s21 = smov 64   ;;  %s5179_s16 = smov 4  }
  0x40   : > { %3422 = dma.hbm_to_vmem [thread:$0]  (!%p4042_p2), %s5204_s4, 2048, %s355_s19, [#allocation9], %s5178_s21, %s5178_s21, %s5179_s16  }
  0x41   : > { %s3663_s29 = scalar_lea.hbm %s5161_s8, 2048 }
  0x42   : > { %p3664_p4 = scmp.ne.s32.totalorder %s5161_s8, %s3663_s29  ;;  %p3670_p11 = scmp.lt.u32.totalorder %s3663_s29, %s5161_s8 }
  0x44   : > { %p3666_p5 = pnand %p3664_p4, %p4054_p3 }
  0x46   : > { %p3667_p6 = pneg %p3666_p5 }
  0x48   : > { %p3672_p12 = pnand %p3670_p11, %p3667_p6 }
  0x4a   : > { %3675 = shalt.err (!%p3672_p12)
}
  0x4b   : > { %s3676_s12 = scalar_lea.vmem %s387_s28, 2048  ;;  %p3684_p8 = scmp.lt.s32.totalorder %s387_s28, %s387_s28 }
  0x4c   : > { %p3677_p13 = scmp.ne.s32.totalorder %s387_s28, %s3676_s12  ;;  %p3685_p9 = scmp.lt.s32.totalorder %s3676_s12, %s3676_s12 }
  0x4e   : > { %p3679_p0 = pnand %p3677_p13, %p4054_p3  ;;  %p3686_p10 = por %p3685_p9, %p3684_p8 }
  0x50   : > { %p3680_p7 = pneg %p3679_p0 }
  0x52   : > { %p3687_p1 = pnand %p3686_p10, %p3680_p7 }
  0x54   : > { %3690 = shalt.err (!%p3687_p1)
}
  0x55   : > { %s3891_s11 = smov 128   ;;  %s3892_s19 = smov 8  }
  0x56   : > { %3428 = dma.hbm_to_vmem [thread:$0]  (!%p4042_p2), %s5161_s8, 2048, %s387_s28, [#allocation12], %s3891_s11, %s3891_s11, %s3892_s19  }
  0x57   : > { %s3893_s27 = smov [#allocation7]   ;;  %s3894_s26 = smov [#allocation10]  }
  0x58   : > { %s338_s15 = sshll.u32 %s3893_s27, 4  ;;  %s370_s29 = sshll.u32 %s3894_s26, 4  ;;  %s339_s15 = int_to_ptr.vmem [resolvable:$true] %s338_s15  ;;  %s371_s29 = int_to_ptr.vmem [resolvable:$true] %s370_s29 }
  0x59   : > { %s3691_s21 = scalar_lea.hbm %s5155_s2, 2048 }
  0x5a   : > { %p3692_p4 = scmp.ne.s32.totalorder %s5155_s2, %s3691_s21  ;;  %p3698_p11 = scmp.lt.u32.totalorder %s3691_s21, %s5155_s2 }
  0x5c   : > { %p3694_p5 = pnand %p3692_p4, %p4054_p3 }
  0x5e   : > { %p3695_p6 = pneg %p3694_p5 }
  0x60   : > { %p3700_p12 = pnand %p3698_p11, %p3695_p6 }
  0x62   : > { %3703 = shalt.err (!%p3700_p12)
}
  0x63   : > { %s3704_s28 = scalar_lea.vmem %s339_s15, 2048  ;;  %p3712_p8 = scmp.lt.s32.totalorder %s339_s15, %s339_s15 }
  0x64   : > { %p3705_p13 = scmp.ne.s32.totalorder %s339_s15, %s3704_s28  ;;  %p3713_p9 = scmp.lt.s32.totalorder %s3704_s28, %s3704_s28 }
  0x66   : > { %p3707_p0 = pnand %p3705_p13, %p4054_p3  ;;  %p3714_p10 = por %p3713_p9, %p3712_p8 }
  0x68   : > { %p3708_p7 = pneg %p3707_p0 }
  0x6a   : > { %p3715_p1 = pnand %p3714_p10, %p3708_p7 }
  0x6c   : > { %3718 = shalt.err (!%p3715_p1)
}
  0x6d   : > { %3419 = dma.hbm_to_vmem [thread:$0]  (!%p4042_p2), %s5155_s2, 2048, %s339_s15, [#allocation6], %s3891_s11, %s3891_s11, %s3892_s19  }
  0x6e   : > { %s3719_s16 = scalar_lea.hbm %s5159_s6, 1024 }
  0x6f   : > { %p3720_p4 = scmp.ne.s32.totalorder %s5159_s6, %s3719_s16  ;;  %p3726_p11 = scmp.lt.u32.totalorder %s3719_s16, %s5159_s6 }
  0x71   : > { %p3722_p5 = pnand %p3720_p4, %p4054_p3 }
  0x73   : > { %p3723_p6 = pneg %p3722_p5 }
  0x75   : > { %p3728_p12 = pnand %p3726_p11, %p3723_p6 }
  0x77   : > { %3731 = shalt.err (!%p3728_p12)
}
  0x78   : > { %s3732_s30 = scalar_lea.vmem %s371_s29, 1024  ;;  %p3740_p8 = scmp.lt.s32.totalorder %s371_s29, %s371_s29 }
  0x79   : > { %p3733_p13 = scmp.ne.s32.totalorder %s371_s29, %s3732_s30  ;;  %p3741_p9 = scmp.lt.s32.totalorder %s3732_s30, %s3732_s30 }
  0x7b   : > { %p3735_p0 = pnand %p3733_p13, %p4054_p3  ;;  %p3742_p10 = por %p3741_p9, %p3740_p8 }
  0x7d   : > { %p3736_p7 = pneg %p3735_p0 }
  0x7f   : > { %p3743_p1 = pnand %p3742_p10, %p3736_p7 }
  0x81   : > { %3746 = shalt.err (!%p3743_p1)
}
  0x82   : > { %s5206_s15 = smov 4   ;;  %s5207_s12 = smov 64  }
  0x83   : > { %3425 = dma.hbm_to_vmem [thread:$0]  (!%p4042_p2), %s5159_s6, 1024, %s371_s29, [#allocation9], %s5207_s12, %s5207_s12, %s5206_s15  }
  0x84   : > { %s3895_s4 = smov [#allocation13]   ;;  %s3747_s7 = scalar_lea.hbm %s5163_s10, 4096 }
  0x85   : > { %s402_s5 = sshll.u32 %s3895_s4, 4  ;;  %p3748_p4 = scmp.ne.s32.totalorder %s5163_s10, %s3747_s7  ;;  %s403_s5 = int_to_ptr.vmem [resolvable:$true] %s402_s5 }
  0x86   : > { %p3754_p11 = scmp.lt.u32.totalorder %s3747_s7, %s5163_s10 }
  0x87   : > { %p3750_p5 = pnand %p3748_p4, %p4054_p3 }
  0x89   : > { %p3751_p6 = pneg %p3750_p5 }
  0x8b   : > { %p3756_p12 = pnand %p3754_p11, %p3751_p6 }
  0x8d   : > { %3759 = shalt.err (!%p3756_p12)
}
  0x8e   : > { %s3760_s29 = scalar_lea.vmem %s403_s5, 4096  ;;  %p3768_p8 = scmp.lt.s32.totalorder %s403_s5, %s403_s5 }
  0x8f   : > { %p3761_p13 = scmp.ne.s32.totalorder %s403_s5, %s3760_s29  ;;  %p3769_p9 = scmp.lt.s32.totalorder %s3760_s29, %s3760_s29 }
  0x91   : > { %p3763_p0 = pnand %p3761_p13, %p4054_p3  ;;  %p3770_p10 = por %p3769_p9, %p3768_p8 }
  0x93   : > { %p3764_p7 = pneg %p3763_p0 }
  0x95   : > { %p3771_p1 = pnand %p3770_p10, %p3764_p7 }
  0x97   : > { %3774 = shalt.err (!%p3771_p1)
}
  0x98   : > { %3431 = dma.hbm_to_vmem [thread:$0]  (!%p4042_p2), %s5163_s10, 4096, %s403_s5, [#allocation12], %s3891_s11, %s3891_s11, %s3892_s19  }
  0x99   : > { %p3052_p4 = scmp.ge.s32.totalorder %s3885_s24, 2 }
  0x9b   : > { %415 = sbr.rel (%p3052_p4) target bundleno = 202 (0xca), region = 56 }
  0xa2   : > { %s419_s18 = sand.u32 1, %s3881_s23   ;;  %s3199_s20 = sshll.u32 %s3885_s24, 9 }
  0xa3   : > { %s3053_s28 = sshll.u32 %s419_s18, 9  ;;  %s429_s11 = scalar_lea.hbm %s5153_s0, %s3199_s20 }
  0xa4   : > { %p5208_p2 = scmp.ne.s32.totalorder %s5196_s13, 0  ;;  %s423_s5 = scalar_lea.vmem [#allocation2], %s3053_s28 }
  0xa5   : > { %s442_s21 = sshll.u32 %s423_s5, 4  ;;  %s3896_s7 = smov 1024   ;;  %s443_s21 = int_to_ptr.vmem [resolvable:$true] %s442_s21 }
  0xa6   : > { %s3393_s19 = scalar_select %p5208_p2, [#allocation0], [#allocation17] }
  0xa7   : > { %3394 = sst [smem:[#allocation16]] (%p5208_p2), %s3896_s7  ;;  %s3897_s9 = smov 512  }
  0xa8   : > { %s434_s16 = sld [smem:[%s3393_s19]]   ;;  %s3898_s27 = smov 8  }
  0xa9   : > { %3395 = sst [smem:[#allocation16 + $0x1]] (%p5208_p2), %s3897_s9  ;;  %s3899_s26 = smov 64  }
  0xaa   : > { %3396 = sst [smem:[#allocation16 + $0x2]] (%p5208_p2), %s3898_s27  ;;  %s3900_s29 = smov 4  }
  0xab   : > { %3397 = sst [smem:[#allocation16 + $0x3]] (%p5208_p2), %s3899_s26  ;;  %s420_s12 = scalar_lea.sflag [#allocation3], %s419_s18 }
  0xac   : > { %3398 = sst [smem:[#allocation16 + $0x4]] (%p5208_p2), %s3899_s26  ;;  %s3901_s20 = smov [#allocation15]  }
  0xad   : > { %3399 = sst [smem:[#allocation16 + $0x5]] (%p5208_p2), %s3900_s29  ;;  %s465_s28 = sand.u32 1, %s3885_s24  }
  0xae   : > { %s3056_s30 = sshll.u32 %s434_s16, 26  ;;  %s3058_s3 = sshll.u32 %s419_s18, 7 }
  0xaf   : > { %s3057_s15 = sadd.s32 134217728, %s3056_s30  ;;  %s3201_s4 = sshll.u32 %s3885_s24, 11 }
  0xb0   : > { %3400 = dma.general (%p5208_p2), %s429_s11, 8192, %s443_s21, %s420_s12, %s3901_s20, [#allocation16], %s3057_s15, 0  }
  0xb1   : > { %s469_s19 = scalar_lea.vmem [#allocation5], %s3058_s3  ;;  %s4186_s16 = scalar_lea.hbm %s5154_s1, %s3201_s4 }
  0xb2   : > { %s477_s5 = sshll.u32 %s469_s19, 4  ;;  %s4190_s11 = scalar_lea.sflag [#allocation6], %s465_s28  ;;  %s4188_s5 = int_to_ptr.vmem [resolvable:$true] %s477_s5 }
  0xb3   : > { %s3775_s21 = scalar_lea.hbm %s4186_s16, 2048  ;;  %s3779_s26 = scalar_lea.hbm %s5154_s1, 4096 }
  0xb4   : > { %p3776_p3 = scmp.ne.s32.totalorder %s4186_s16, %s3775_s21  ;;  %p3780_p11 = scmp.lt.u32.totalorder %s4186_s16, %s5154_s1 }
  0xb5   : > { %p3781_p12 = scmp.lt.u32.totalorder %s3779_s26, %s3775_s21  ;;  %p3783_p0 = scmp.lt.u32.totalorder %s3775_s21, %s4186_s16 }
  0xb6   : > { %p3777_p5 = pnand %p3776_p3, %p5208_p2 }
  0xb7   : > { %p3782_p13 = por %p3781_p12, %p3780_p11 }
  0xb8   : > { %p3778_p6 = pneg %p3777_p5 }
  0xb9   : > { %p3784_p7 = por %p3783_p0, %p3782_p13 }
  0xbb   : > { %p3785_p8 = pnand %p3784_p7, %p3778_p6 }
  0xbd   : > { %3788 = shalt.err (!%p3785_p8)
}
  0xbe   : > { %s3789_s15 = scalar_lea.vmem %s4188_s5, 2048  ;;  %s3902_s12 = smov [#allocation5]  }
  0xbf   : > { %p3790_p9 = scmp.ne.s32.totalorder %s4188_s5, %s3789_s15  ;;  %s3793_s20 = sshll.u32 %s3902_s12, 4  ;;  %s3794_s20 = int_to_ptr.vmem [resolvable:$false] %s3793_s20 }
  0xc0   : > { %s3795_s28 = scalar_lea.vmem %s3794_s20, 4096  ;;  %p3796_p3 = scmp.lt.s32.totalorder %s4188_s5, %s3794_s20 }
  0xc1   : > { %p3791_p10 = pnand %p3790_p9, %p5208_p2  ;;  %p3797_p5 = scmp.lt.s32.totalorder %s3795_s28, %s3789_s15 }
  0xc3   : > { %p3792_p1 = pneg %p3791_p10  ;;  %p3798_p11 = por %p3797_p5, %p3796_p3 }
  0xc5   : > { %p3799_p12 = pnand %p3798_p11, %p3792_p1 }
  0xc7   : > { %3802 = shalt.err (!%p3799_p12)
}
  0xc8   : > { %s3903_s3 = smov 256   ;;  %s3904_s4 = smov 16  }
  0xc9   : > { %3401 = dma.hbm_to_vmem [thread:$0]  (%p5208_p2), %s4186_s16, 2048, %s4188_s5, %s4190_s11, %s3903_s3, %s3903_s3, %s3904_s4  }
  0xca PF: > { %p5209_p6 = scmp.ne.s32.totalorder %s5202_s17, 0 }
  0xcc   : > { %489 = sbr.rel (%p5209_p6) target bundleno = 1716 (0x6b4), region = 68 }
  0xd3   : > { %s4217_s19 = sand.u32 1, %s3877_s22   ;;  %p5210_p13 = scmp.ne.s32.totalorder %s5197_s14, 0 }
  0xd4   : > { %s3063_s7 = sshll.u32 %s4217_s19, 9  ;;  %s492_s9 = scalar_lea.sflag [#allocation3], %s4217_s19 }
  0xd5   : > { %s4221_s21 = scalar_lea.vmem [#allocation2], %s3063_s7 }
  0xd6   : > { %3848 = dma.done.wait (%p5210_p13), %s492_s9, 8192  }
  0xd7   : > { %3850 = vsyncadd (%p5210_p13), %s492_s9, 4294959104  ;;  %s500_s13 = sand.u32 1, %s3995_s25   ;;  %s3064_s17 = sshll.u32 %s4217_s19, 7 }
  0xd8   : > { %s501_s5 = scalar_lea.sflag [#allocation6], %s500_s13  ;;  %s4229_s16 = scalar_lea.vmem [#allocation5], %s3064_s17 }
  0xd9   : > { %3852 = dma.done.wait (%p5210_p13), %s501_s5, 2048  }
  0xda   : > { %3854 = vsyncadd (%p5210_p13), %s501_s5, 4294965248  ;;  %p5211_p2 = scmp.eq.s32.totalorder %s3995_s25, 0 }
  0xdc   : > { %3856 = dma.done.wait (%p5211_p2), [#allocation6], 2048   ;;  %p5212_p0 = pmov %p5211_p2 }
  0xde   : > { %3858 = vsyncadd (%p5212_p0), [#allocation6], 4294965248  ;;  %p5213_p7 = pmov %p5212_p0 }
  0xdf   : > { %p5214_p8 = pmov %p5212_p0 }
  0xe0   : > { %3860 = dma.done.wait (%p5213_p7), [#allocation9], 3072  }
  0xe1   : > { %3862 = vsyncadd (%p5214_p8), [#allocation9], 4294964224  ;;  %p5215_p9 = pmov %p5212_p0 }
  0xe2   : > { %p5216_p10 = pmov %p5212_p0 }
  0xe3   : > { %3864 = dma.done.wait (%p5215_p9), [#allocation12], 6144  }
  0xe4   : > { %3866 = vsyncadd (%p5216_p10), [#allocation12], 4294961152  ;;  %v5180_v0 = vmov 0   ;;  %v3499_v1 = vld [vmem:[#allocation7 + $0x4] ss:$8 sps:$4 sm:$0xff]   ;;  %v3525_v21 = vld [vmem:[%s4221_s21 + $0x10] sm:$0xff]  }
  0xe5   : > { %1214 = vmatprep.mubr.bf16.mxu0 %v5180_v0  ;;  %1614 = vmatprep.mubr.bf16.mxu1 %v5180_v0  ;;  %v3501_v2 = vld [vmem:[#allocation7] ss:$8 sps:$4 sm:$0xff]   ;;  %v3502_v3 = vld [vmem:[#allocation7 + $0x14] ss:$8 sps:$4 sm:$0xff]   ;;  %v3504_v4 = vld [vmem:[#allocation7 + $0x10] ss:$8 sps:$4 sm:$0xff]  }
  0xe6   : > { %1182 = vmatprep.subr.bf16.mxu0 %v3499_v1  ;;  %3367 = vmatprep.subr.bf16.mxu1 %v3499_v1  ;;  %v3505_v5 = vld [vmem:[#allocation7 + $0x24] ss:$8 sps:$4 sm:$0xff]   ;;  %v3507_v6 = vld [vmem:[#allocation7 + $0x20] ss:$8 sps:$4 sm:$0xff]   ;;  %v3508_v7 = vld [vmem:[#allocation7 + $0x34] ss:$8 sps:$4 sm:$0xff]  }
  0xe7   : > { %1183 = vmatpush1.bf16.msra.mxu0 %v3501_v2  ;;  %3375 = vmatpush1.bf16.msra.mxu1 %v3501_v2  ;;  %v3510_v8 = vld [vmem:[#allocation7 + $0x30] ss:$8 sps:$4 sm:$0xff]   ;;  %v3511_v9 = vld [vmem:[#allocation7 + $0x44] ss:$8 sps:$4 sm:$0xff]   ;;  %v3513_v10 = vld [vmem:[#allocation7 + $0x40] ss:$8 sps:$4 sm:$0xff]  }
  0xe8   : > { %1184 = vmatprep.subr.bf16.mxu0 %v3502_v3  ;;  %3368 = vmatprep.subr.bf16.mxu1 %v3502_v3  ;;  %v3514_v11 = vld [vmem:[#allocation7 + $0x54] ss:$8 sps:$4 sm:$0xff]   ;;  %v3516_v12 = vld [vmem:[#allocation7 + $0x50] ss:$8 sps:$4 sm:$0xff]   ;;  %v3517_v13 = vld [vmem:[#allocation7 + $0x64] ss:$8 sps:$4 sm:$0xff]  }
  0xe9   : > { %v3519_v14 = vld [vmem:[#allocation7 + $0x60] ss:$8 sps:$4 sm:$0xff]   ;;  %v3520_v15 = vld [vmem:[#allocation7 + $0x74] ss:$8 sps:$4 sm:$0xff]   ;;  %v3522_v16 = vld [vmem:[#allocation7 + $0x70] ss:$8 sps:$4 sm:$0xff]  }
  0xea   : > { %v3523_v17 = vld [vmem:[%s4221_s21] sm:$0xff]   ;;  %v3524_v19 = vld [vmem:[%s4221_s21 + $0x8] sm:$0xff]   ;;  %v3545_v22 = vld [vmem:[%s4221_s21 + $0x150] sm:$0xff]   ;;  %s5305_s18 = sld [smem:[#allocation72_spill]]  ;;  %s5332_s30 = sld [smem:[#allocation74_spill]] }
  0xeb   : > { %1185 = vmatpush1.bf16.msra.mxu0 %v3504_v4  ;;  %3376 = vmatpush1.bf16.msra.mxu1 %v3504_v4  ;;  %v3541_v18 = vld [vmem:[%s4221_s21 + $0x140] sm:$0xff]   ;;  %v3543_v20 = vld [vmem:[%s4221_s21 + $0x148] sm:$0xff]   ;;  %v3526_v23 = vld [vmem:[%s4221_s21 + $0x18] sm:$0xff]   ;;  %s5334_s12 = sld [smem:[#allocation75_spill]]  ;;  %s5335_s3 = sld [smem:[#allocation76_spill]] }
  0xec   : > { %1186 = vmatprep.subr.bf16.mxu0 %v3505_v5  ;;  %3369 = vmatprep.subr.bf16.mxu1 %v3505_v5  ;;  %v3547_v24 = vld [vmem:[%s4221_s21 + $0x158] sm:$0xff]   ;;  %v3527_v25 = vld [vmem:[%s4221_s21 + $0x20] sm:$0xff]   ;;  %v3528_v27 = vld [vmem:[%s4221_s21 + $0x28] sm:$0xff]   ;;  %s3070_s4 = sshll.u32 %s4217_s19, 6  ;;  %s5337_s17 = sld [smem:[#allocation27_spill]] }
  0xed   : > { %v3549_v26 = vld [vmem:[%s4221_s21 + $0x160] sm:$0xff]   ;;  %v3551_v28 = vld [vmem:[%s4221_s21 + $0x168] sm:$0xff]   ;;  %v3529_v29 = vld [vmem:[%s4221_s21 + $0x30] sm:$0xff]   ;;  %s5092_s13 = scalar_lea.vmem [#allocation14], %s3070_s4  ;;  %s2889_s26 = scalar_lea.sflag [#allocation4], %s4217_s19 }
  0xee   : > { %v3553_v30 = vld [vmem:[%s4221_s21 + $0x170] sm:$0xff]   ;;  %v3530_v31 = vld [vmem:[%s4221_s21 + $0x38] sm:$0xff]   ;;  %v3531_v33 = vld [vmem:[%s4221_s21 + $0x40] sm:$0xff]   ;;  %s2902_s5 = sshll.u32 %s5092_s13, 4  ;;  %s5102_s5 = int_to_ptr.vmem [resolvable:$true] %s2902_s5 }
  0xef   : > { %1187 = vmatpush1.bf16.msra.mxu0 %v3507_v6  ;;  %3377 = vmatpush1.bf16.msra.mxu1 %v3507_v6  ;;  %v3555_v32 = vld [vmem:[%s4221_s21 + $0x178] sm:$0xff]   ;;  %v3557_v34 = vld [vmem:[%s4221_s21 + $0x180] sm:$0xff]   ;;  %v3532_v35 = vld [vmem:[%s4221_s21 + $0x48] sm:$0xff]  }
  0xf0   : > { %1188 = vmatprep.subr.bf16.mxu0 %v3508_v7  ;;  %3370 = vmatprep.subr.bf16.mxu1 %v3508_v7  ;;  %v3559_v36 = vld [vmem:[%s4221_s21 + $0x188] sm:$0xff]   ;;  %v3533_v37 = vld [vmem:[%s4221_s21 + $0x50] sm:$0xff]   ;;  %v3534_v39 = vld [vmem:[%s4221_s21 + $0x58] sm:$0xff]  }
  0xf1   : > { %v3561_v38 = vld [vmem:[%s4221_s21 + $0x190] sm:$0xff]   ;;  %v3563_v40 = vld [vmem:[%s4221_s21 + $0x198] sm:$0xff]   ;;  %v3535_v41 = vld [vmem:[%s4221_s21 + $0x60] sm:$0xff]  }
  0xf2   : > { %v3565_v42 = vld [vmem:[%s4221_s21 + $0x1a0] sm:$0xff]   ;;  %v3536_v43 = vld [vmem:[%s4221_s21 + $0x68] sm:$0xff]   ;;  %v3537_v45 = vld [vmem:[%s4221_s21 + $0x70] sm:$0xff]   ;;  %p5339_p3 = scmp.ne.s32.totalorder %s5337_s17, 0 }
  0xf3   : > { %1189 = vmatpush1.bf16.msra.mxu0 %v3510_v8  ;;  %3378 = vmatpush1.bf16.msra.mxu1 %v3510_v8  ;;  %v3567_v44 = vld [vmem:[%s4221_s21 + $0x1a8] sm:$0xff]   ;;  %v3569_v46 = vld [vmem:[%s4221_s21 + $0x1b0] sm:$0xff]   ;;  %v3538_v47 = vld [vmem:[%s4221_s21 + $0x78] sm:$0xff]  }
  0xf4   : > { %1190 = vmatprep.subr.bf16.mxu0 %v3511_v9  ;;  %3371 = vmatprep.subr.bf16.mxu1 %v3511_v9  ;;  %v3571_v48 = vld [vmem:[%s4221_s21 + $0x1b8] sm:$0xff]   ;;  %v3539_v49 = vld [vmem:[%s4221_s21 + $0x80] sm:$0xff]   ;;  %v3540_v51 = vld [vmem:[%s4221_s21 + $0x88] sm:$0xff]  }
  0xf5   : > { %v3573_v50 = vld [vmem:[%s4221_s21 + $0x1c0] sm:$0xff]   ;;  %v3575_v52 = vld [vmem:[%s4221_s21 + $0x1c8] sm:$0xff]   ;;  %v3542_v53 = vld [vmem:[%s4221_s21 + $0x90] sm:$0xff]  }
  0xf6   : > { %v3577_v54 = vld [vmem:[%s4221_s21 + $0x1d0] sm:$0xff]   ;;  %v3544_v55 = vld [vmem:[%s4221_s21 + $0x98] sm:$0xff]   ;;  %v3546_v57 = vld [vmem:[%s4221_s21 + $0xa0] sm:$0xff]  }
  0xf7   : > { %1191 = vmatpush1.bf16.msra.mxu0 %v3513_v10  ;;  %3379 = vmatpush1.bf16.msra.mxu1 %v3513_v10  ;;  %v3579_v56 = vld [vmem:[%s4221_s21 + $0x1d8] sm:$0xff]   ;;  %v3581_v58 = vld [vmem:[%s4221_s21 + $0x1e0] sm:$0xff]   ;;  %v3548_v59 = vld [vmem:[%s4221_s21 + $0xa8] sm:$0xff]  }
  0xf8   : > { %1192 = vmatprep.subr.bf16.mxu0 %v3514_v11  ;;  %3372 = vmatprep.subr.bf16.mxu1 %v3514_v11  ;;  %v3583_v60 = vld [vmem:[%s4221_s21 + $0x1e8] sm:$0xff]   ;;  %v3550_v61 = vld [vmem:[%s4221_s21 + $0xb0] sm:$0xff]   ;;  %v3552_v63 = vld [vmem:[%s4221_s21 + $0xb8] sm:$0xff]  }
  0xf9   : > { %v3585_v62 = vld [vmem:[%s4221_s21 + $0x1f0] sm:$0xff]   ;;  %v3586_v1 = vld [vmem:[%s4221_s21 + $0x1f8] sm:$0xff]   ;;  %v3554_v2 = vld [vmem:[%s4221_s21 + $0xc0] sm:$0xff]  }
  0xfa   : > { %v3556_v3 = vld [vmem:[%s4221_s21 + $0xc8] sm:$0xff]   ;;  %v3558_v4 = vld [vmem:[%s4221_s21 + $0xd0] sm:$0xff]   ;;  %v3587_v5 = vld [vmem:[#allocation8 + $0x40] sm:$0xff]  }
  0xfb   : > { %1193 = vmatpush1.bf16.msra.mxu0 %v3516_v12  ;;  %3380 = vmatpush1.bf16.msra.mxu1 %v3516_v12  ;;  %v3588_v6 = vld [vmem:[#allocation8] sm:$0xff]   ;;  %v3560_v9 = vld [vmem:[%s4221_s21 + $0xd8] sm:$0xff]  }
  0xfc   : > { %1194 = vmatprep.subr.bf16.mxu0 %v3517_v13  ;;  %3373 = vmatprep.subr.bf16.mxu1 %v3517_v13 }
  0xff   : > { %1195 = vmatpush1.bf16.msra.mxu0 %v3519_v14  ;;  %3381 = vmatpush1.bf16.msra.mxu1 %v3519_v14 }
 0x100   : > { %1196 = vmatprep.subr.bf16.mxu0 %v3520_v15  ;;  %3374 = vmatprep.subr.bf16.mxu1 %v3520_v15 }
 0x103   : > { %1197 = vmatpush1.bf16.msra.mxu0 %v3522_v16  ;;  %3382 = vmatpush1.bf16.msra.mxu1 %v3522_v16 }
 0x104   : > { %3203 = vmatprep.subr.bf16.mxu1 %v3587_v5 }
 0x106   : > { %1215 = vmatmul.mubr.bf16.vlgmr.msra.gmra.mrb[0].mxu0 %v3523_v17  ;;  %1615 = vmatmul.mubr.bf16.vlgmr.msra.gmra.mrb[0].mxu1 %v3541_v18  ;;  %v3562_v18 = vld [vmem:[%s4221_s21 + $0xe0] sm:$0xff]  }
 0x107   : > { %1224 = vmatprep.mubr.bf16.mxu0 %v5180_v0  ;;  %1624 = vmatprep.mubr.bf16.mxu1 %v5180_v0 }
 0x108   : > { %3204 = vmatpush3.bf16.msra.mxu1 %v3588_v6 }
 0x10e   : > { %1225 = vmatmul.mubr.bf16.gmra.mrb[4].mxu0 %v3524_v19  ;;  %1625 = vmatmul.mubr.bf16.gmra.mrb[4].mxu1 %v3543_v20 }
 0x10f   : > { %1234 = vmatprep.mubr.bf16.mxu0 %v5180_v0  ;;  %1634 = vmatprep.mubr.bf16.mxu1 %v5180_v0 }
 0x116   : > { %1235 = vmatmul.mubr.bf16.gmra.mrb[8].mxu0 %v3525_v21  ;;  %1635 = vmatmul.mubr.bf16.gmra.mrb[8].mxu1 %v3545_v22 }
 0x117   : > { %1244 = vmatprep.mubr.bf16.mxu0 %v5180_v0  ;;  %1644 = vmatprep.mubr.bf16.mxu1 %v5180_v0 }
 0x11e   : > { %1245 = vmatmul.mubr.bf16.gmra.mrb[12].mxu0 %v3526_v23  ;;  %1645 = vmatmul.mubr.bf16.gmra.mrb[12].mxu1 %v3547_v24 }
 0x11f   : > { %1254 = vmatprep.mubr.bf16.mxu0 %v5180_v0  ;;  %1654 = vmatprep.mubr.bf16.mxu1 %v5180_v0 }
 0x126   : > { %1255 = vmatmul.mubr.bf16.gmra.mrb[16].mxu0 %v3527_v25  ;;  %1655 = vmatmul.mubr.bf16.gmra.mrb[16].mxu1 %v3549_v26 }
 0x127   : > { %1264 = vmatprep.mubr.bf16.mxu0 %v5180_v0  ;;  %1664 = vmatprep.mubr.bf16.mxu1 %v5180_v0 }
 0x12e   : > { %1265 = vmatmul.mubr.bf16.gmra.mrb[20].mxu0 %v3528_v27  ;;  %1665 = vmatmul.mubr.bf16.gmra.mrb[20].mxu1 %v3551_v28  ;;  %v3564_v27 = vld [vmem:[%s4221_s21 + $0xe8] sm:$0xff]  }
 0x12f   : > { %1274 = vmatprep.mubr.bf16.mxu0 %v5180_v0  ;;  %1674 = vmatprep.mubr.bf16.mxu1 %v5180_v0 }
 0x136   : > { %1275 = vmatmul.mubr.bf16.gmra.mrb[24].mxu0 %v3529_v29  ;;  %1675 = vmatmul.mubr.bf16.gmra.mrb[24].mxu1 %v3553_v30 }
 0x137   : > { %1284 = vmatprep.mubr.bf16.mxu0 %v5180_v0  ;;  %1684 = vmatprep.mubr.bf16.mxu1 %v5180_v0 }
 0x13e   : > { %1285 = vmatmul.mubr.bf16.gmra.mrb[28].mxu0 %v3530_v31  ;;  %1685 = vmatmul.mubr.bf16.gmra.mrb[28].mxu1 %v3555_v32  ;;  %v3589_v31 = vld [vmem:[#allocation8 + $0x48] sm:$0xff]  }
 0x13f   : > { %1294 = vmatprep.mubr.bf16.mxu0 %v5180_v0  ;;  %1694 = vmatprep.mubr.bf16.mxu1 %v5180_v0 }
 0x140   : > { %3205 = vmatprep.subr.bf16.mxu1 %v3589_v31 }
 0x146   : > { %1295 = vmatmul.mubr.bf16.gmra.mrb[32].mxu0 %v3531_v33  ;;  %1695 = vmatmul.mubr.bf16.gmra.mrb[32].mxu1 %v3557_v34  ;;  %v3590_v33 = vld [vmem:[#allocation8 + $0x8] sm:$0xff]  }
 0x147   : > { %1304 = vmatprep.mubr.bf16.mxu0 %v5180_v0  ;;  %1704 = vmatprep.mubr.bf16.mxu1 %v5180_v0 }
 0x148   : > { %3206 = vmatpush3.bf16.msra.mxu1 %v3590_v33 }
 0x14e   : > { %1305 = vmatmul.mubr.bf16.gmra.mrb[36].mxu0 %v3532_v35  ;;  %1705 = vmatmul.mubr.bf16.gmra.mrb[36].mxu1 %v3559_v36 }
 0x14f   : > { %1314 = vmatprep.mubr.bf16.mxu0 %v5180_v0  ;;  %1714 = vmatprep.mubr.bf16.mxu1 %v5180_v0 }
 0x156   : > { %1315 = vmatmul.mubr.bf16.gmra.mrb[40].mxu0 %v3533_v37  ;;  %1715 = vmatmul.mubr.bf16.gmra.mrb[40].mxu1 %v3561_v38  ;;  %v3566_v38 = vld [vmem:[%s4221_s21 + $0xf0] sm:$0xff]  }
 0x157   : > { %1324 = vmatprep.mubr.bf16.mxu0 %v5180_v0  ;;  %1724 = vmatprep.mubr.bf16.mxu1 %v5180_v0 }
 0x15e   : > { %1325 = vmatmul.mubr.bf16.gmra.mrb[44].mxu0 %v3534_v39  ;;  %1725 = vmatmul.mubr.bf16.gmra.mrb[44].mxu1 %v3563_v40 }
 0x15f   : > { %1334 = vmatprep.mubr.bf16.mxu0 %v5180_v0  ;;  %1734 = vmatprep.mubr.bf16.mxu1 %v5180_v0 }
 0x166   : > { %1335 = vmatmul.mubr.bf16.gmra.mrb[48].mxu0 %v3535_v41  ;;  %1735 = vmatmul.mubr.bf16.gmra.mrb[48].mxu1 %v3565_v42 }
 0x167   : > { %1344 = vmatprep.mubr.bf16.mxu0 %v5180_v0  ;;  %1744 = vmatprep.mubr.bf16.mxu1 %v5180_v0 }
 0x16e   : > { %1345 = vmatmul.mubr.bf16.gmra.mrb[52].mxu0 %v3536_v43  ;;  %1745 = vmatmul.mubr.bf16.gmra.mrb[52].mxu1 %v3567_v44 }
 0x16f   : > { %1354 = vmatprep.mubr.bf16.mxu0 %v5180_v0  ;;  %1754 = vmatprep.mubr.bf16.mxu1 %v5180_v0 }
 0x176   : > { %1355 = vmatmul.mubr.bf16.gmra.mrb[56].mxu0 %v3537_v45  ;;  %1755 = vmatmul.mubr.bf16.gmra.mrb[56].mxu1 %v3569_v46  ;;  %v5230_v46 = vmov 0  }
 0x177   : > { %1364 = vmatprep.mubr.bf16.mxu0 %v5180_v0  ;;  %1764 = vmatprep.mubr.bf16.mxu1 %v5180_v0 }
 0x17e   : > { %1365 = vmatmul.mubr.bf16.gmra.mrb[60].mxu0 %v3538_v47  ;;  %1765 = vmatmul.mubr.bf16.gmra.mrb[60].mxu1 %v3571_v48  ;;  %v3568_v48 = vld [vmem:[%s4221_s21 + $0xf8] sm:$0xff]  }
 0x17f   : > { %1374 = vmatprep.mubr.bf16.mxu0 %v5180_v0  ;;  %1774 = vmatprep.mubr.bf16.mxu1 %v5180_v0 }
 0x186   : > { %1375 = vmatmul.mubr.bf16.gmra.mrb[64].mxu0 %v3539_v49  ;;  %1775 = vmatmul.mubr.bf16.gmra.mrb[64].mxu1 %v3573_v50  ;;  %v3574_v49 = vld [vmem:[%s4221_s21 + $0x110] sm:$0xff]  }
 0x187   : > { %1384 = vmatprep.mubr.bf16.mxu0 %v5180_v0  ;;  %1784 = vmatprep.mubr.bf16.mxu1 %v5180_v0 }
 0x18e   : > { %1385 = vmatmul.mubr.bf16.gmra.mrb[68].mxu0 %v3540_v51  ;;  %1785 = vmatmul.mubr.bf16.gmra.mrb[68].mxu1 %v3575_v52 }
 0x18f   : > { %1394 = vmatprep.mubr.bf16.mxu0 %v5180_v0  ;;  %1794 = vmatprep.mubr.bf16.mxu1 %v5180_v0 }
 0x196   : > { %1395 = vmatmul.mubr.bf16.gmra.mrb[72].mxu0 %v3542_v53  ;;  %1795 = vmatmul.mubr.bf16.gmra.mrb[72].mxu1 %v3577_v54 }
 0x197   : > { %1404 = vmatprep.mubr.bf16.mxu0 %v5180_v0  ;;  %1804 = vmatprep.mubr.bf16.mxu1 %v5180_v0 }
 0x19e   : > { %1405 = vmatmul.mubr.bf16.gmra.mrb[76].mxu0 %v3544_v55  ;;  %1805 = vmatmul.mubr.bf16.gmra.mrb[76].mxu1 %v3579_v56 }
 0x19f   : > { %1414 = vmatprep.mubr.bf16.mxu0 %v5180_v0  ;;  %1814 = vmatprep.mubr.bf16.mxu1 %v5180_v0 }
 0x1a6   : > { %1415 = vmatmul.mubr.bf16.gmra.mrb[80].mxu0 %v3546_v57  ;;  %1815 = vmatmul.mubr.bf16.gmra.mrb[80].mxu1 %v3581_v58 }
 0x1a7   : > { %1424 = vmatprep.mubr.bf16.mxu0 %v5180_v0  ;;  %1824 = vmatprep.mubr.bf16.mxu1 %v5180_v0 }
 0x1ae   : > { %1425 = vmatmul.mubr.bf16.gmra.mrb[84].mxu0 %v3548_v59  ;;  %1825 = vmatmul.mubr.bf16.gmra.mrb[84].mxu1 %v3583_v60 }
 0x1af   : > { %1434 = vmatprep.mubr.bf16.mxu0 %v5180_v0  ;;  %1834 = vmatprep.mubr.bf16.mxu1 %v5180_v0 }
 0x1b6   : > { %1435 = vmatmul.mubr.bf16.gmra.mrb[88].mxu0 %v3550_v61  ;;  %1835 = vmatmul.mubr.bf16.gmra.mrb[88].mxu1 %v3585_v62  ;;  %v3570_v61 = vld [vmem:[%s4221_s21 + $0x100] sm:$0xff]  }
 0x1b7   : > { %1444 = vmatprep.mubr.bf16.mxu0 %v5180_v0  ;;  %1844 = vmatprep.mubr.bf16.mxu1 %v5180_v0 }
 0x1be   : > { %1445 = vmatmul.mubr.bf16.gmra.mrb[92].mxu0 %v3552_v63  ;;  %1845 = vmatmul.mubr.bf16.gmra.mrb[92].mxu1 %v3586_v1 }
 0x1bf   : > { %1454 = vmatprep.mubr.bf16.mxu0 %v5180_v0 }
 0x1c6   : > { %1455 = vmatmul.mubr.bf16.gmra.mrb[96].mxu0 %v3554_v2 }
 0x1c7   : > { %1464 = vmatprep.mubr.bf16.mxu0 %v5180_v0 }
 0x1ce   : > { %1465 = vmatmul.mubr.bf16.gmra.mrb[100].mxu0 %v3556_v3 }
 0x1cf   : > { %1474 = vmatprep.mubr.bf16.mxu0 %v5180_v0 }
 0x1d6   : > { %1475 = vmatmul.mubr.bf16.gmra.mrb[104].mxu0 %v3558_v4  ;;  %v3591_v4 = vld [vmem:[#allocation8 + $0x50] sm:$0xff]  }
 0x1d7   : > { %1484 = vmatprep.mubr.bf16.mxu0 %v5180_v0  ;;  %3207 = vmatprep.subr.bf16.mxu1 %v3591_v4 }
 0x1d9   : > { %v4350_v7 = vpop.f32.mrb[0].mxu0  ;;  %v4357_v11 = vpop.f32.mrb[0].mxu1 }
 0x1da   : > { %v4352_v8 = vpop.f32.mrb[1].mxu0  ;;  %5217 = vst [vmem:[#allocation29_spill] sm:$0xff] %v4357_v11  ;;  %v4361_v13 = vpop.f32.mrb[1].mxu1 }
 0x1db   : > { %v4355_v10 = vpop.f32.mrb[2].mxu0  ;;  %5218 = vst [vmem:[#allocation30_spill] sm:$0xff] %v4361_v13  ;;  %v4363_v14 = vpop.f32.mrb[2].mxu1 }
 0x1dc   : > { %v4359_v12 = vpop.f32.mrb[3].mxu0  ;;  %5219 = vst [vmem:[#allocation31_spill] sm:$0xff] %v4363_v14  ;;  %v4365_v15 = vpop.f32.mrb[3].mxu1 }
 0x1de   : > { %1485 = vmatmul.mubr.bf16.gmra.mrb[108].mxu0 %v3560_v9  ;;  %v3592_v9 = vld [vmem:[#allocation8 + $0x10] sm:$0xff]  }
 0x1df   : > { %1494 = vmatprep.mubr.bf16.mxu0 %v5180_v0  ;;  %3208 = vmatpush3.bf16.msra.mxu1 %v3592_v9 }
 0x1e1   : > { %v4368_v16 = vpop.f32.mrb[4].mxu0  ;;  %v4375_v20 = vpop.f32.mrb[4].mxu1 }
 0x1e2   : > { %v4370_v17 = vpop.f32.mrb[5].mxu0  ;;  %v4379_v22 = vpop.f32.mrb[5].mxu1 }
 0x1e3   : > { %v4373_v19 = vpop.f32.mrb[6].mxu0  ;;  %v4381_v23 = vpop.f32.mrb[6].mxu1 }
 0x1e4   : > { %v4377_v21 = vpop.f32.mrb[7].mxu0  ;;  %v4383_v24 = vpop.f32.mrb[7].mxu1 }
 0x1e6   : > { %1495 = vmatmul.mubr.bf16.gmra.mrb[112].mxu0 %v3562_v18 }
 0x1e7   : > { %1504 = vmatprep.mubr.bf16.mxu0 %v5180_v0 }
 0x1e9   : > { %v4386_v25 = vpop.f32.mrb[8].mxu0  ;;  %v4393_v29 = vpop.f32.mrb[8].mxu1 }
 0x1ea   : > { %v4388_v26 = vpop.f32.mrb[9].mxu0  ;;  %v4397_v32 = vpop.f32.mrb[9].mxu1 }
 0x1eb   : > { %v4391_v28 = vpop.f32.mrb[10].mxu0  ;;  %v4399_v34 = vpop.f32.mrb[10].mxu1 }
 0x1ec   : > { %v4395_v30 = vpop.f32.mrb[11].mxu0  ;;  %v4401_v35 = vpop.f32.mrb[11].mxu1 }
 0x1ee   : > { %1505 = vmatmul.mubr.bf16.gmra.mrb[116].mxu0 %v3564_v27 }
 0x1ef   : > { %1514 = vmatprep.mubr.bf16.mxu0 %v5180_v0 }
 0x1f1   : > { %v4404_v36 = vpop.f32.mrb[12].mxu0  ;;  %v4411_v40 = vpop.f32.mrb[12].mxu1 }
 0x1f2   : > { %v4406_v37 = vpop.f32.mrb[13].mxu0  ;;  %v4415_v42 = vpop.f32.mrb[13].mxu1 }
 0x1f3   : > { %v4409_v39 = vpop.f32.mrb[14].mxu0  ;;  %v4417_v43 = vpop.f32.mrb[14].mxu1 }
 0x1f4   : > { %v4413_v41 = vpop.f32.mrb[15].mxu0  ;;  %v4419_v44 = vpop.f32.mrb[15].mxu1 }
 0x1f6   : > { %1515 = vmatmul.mubr.bf16.gmra.mrb[120].mxu0 %v3566_v38 }
 0x1f7   : > { %1524 = vmatprep.mubr.bf16.mxu0 %v5180_v0 }
 0x1f9   : > { %v4422_v45 = vpop.f32.mrb[16].mxu0  ;;  %v4433_v51 = vpop.f32.mrb[16].mxu1 }
 0x1fa   : > { %v4426_v47 = vpop.f32.mrb[17].mxu0  ;;  %5220 = vst [vmem:[#allocation32_spill] sm:$0xff] %v4433_v51  ;;  %v4439_v54 = vpop.f32.mrb[17].mxu1  ;;  %v5231_v11 = vmax.f32 %v4350_v7, %v4422_v45  ;;  %v3593_v7 = vld [vmem:[#allocation8 + $0x58] sm:$0xff]  }
 0x1fb   : > { %v4431_v50 = vpop.f32.mrb[18].mxu0  ;;  %5221 = vst [vmem:[#allocation33_spill] sm:$0xff] %v4439_v54  ;;  %v4443_v56 = vpop.f32.mrb[18].mxu1  ;;  %3209 = vmatprep.subr.bf16.mxu1 %v3593_v7 }
 0x1fc   : > { %v4437_v53 = vpop.f32.mrb[19].mxu0  ;;  %5222 = vst [vmem:[#allocation34_spill] sm:$0xff] %v4443_v56  ;;  %v4445_v57 = vpop.f32.mrb[19].mxu1 }
 0x1fe   : > { %1525 = vmatmul.mubr.bf16.gmra.mrb[124].mxu0 %v3568_v48  ;;  %v3572_v48 = vld [vmem:[%s4221_s21 + $0x108] sm:$0xff]  }
 0x1ff   : > { %1534 = vmatprep.mubr.bf16.mxu0 %v5180_v0 }
 0x201   : > { %v4448_v58 = vpop.f32.mrb[20].mxu0  ;;  %v4459_v1 = vpop.f32.mrb[20].mxu1 }
 0x202   : > { %v4452_v60 = vpop.f32.mrb[21].mxu0  ;;  %v4465_v5 = vpop.f32.mrb[21].mxu1 }
 0x203   : > { %v4457_v63 = vpop.f32.mrb[22].mxu0  ;;  %v4469_v18 = vpop.f32.mrb[22].mxu1 }
 0x204   : > { %v4463_v3 = vpop.f32.mrb[23].mxu0  ;;  %v4471_v27 = vpop.f32.mrb[23].mxu1  ;;  %v5240_v7 = vmax.f32 %v4373_v19, %v4457_v63 }
 0x206   : > { %1535 = vmatmul.mubr.bf16.gmra.mrb[128].mxu0 %v3570_v61 }
 0x207   : > { %1544 = vmatprep.mubr.bf16.mxu0 %v5180_v0 }
 0x209   : > { %v4474_v31 = vpop.f32.mrb[24].mxu0  ;;  %v4485_v61 = vpop.f32.mrb[24].mxu1 }
 0x20a   : > { %v4478_v38 = vpop.f32.mrb[25].mxu0  ;;  %v4491_v62 = vpop.f32.mrb[25].mxu1  ;;  %v5242_v19 = vmax.f32 %v4386_v25, %v4474_v31 }
 0x20b   : > { %v4483_v2 = vpop.f32.mrb[26].mxu0  ;;  %5223 = vst [vmem:[#allocation35_spill] sm:$0xff] %v4491_v62  ;;  %v4495_v59 = vpop.f32.mrb[26].mxu1 }
 0x20c   : > { %v4489_v9 = vpop.f32.mrb[27].mxu0  ;;  %5224 = vst [vmem:[#allocation36_spill] sm:$0xff] %v4495_v59  ;;  %v4497_v55 = vpop.f32.mrb[27].mxu1 }
 0x20d   : > { %5225 = vst [vmem:[#allocation37_spill] sm:$0xff] %v4497_v55  ;;  %v3576_v55 = vld [vmem:[%s4221_s21 + $0x118] sm:$0xff]   ;;  %v5245_v31 = vmax.f32 %v4395_v30, %v4489_v9 }
 0x20e   : > { %1545 = vmatmul.mubr.bf16.gmra.mrb[132].mxu0 %v3572_v48 }
 0x20f   : > { %1554 = vmatprep.mubr.bf16.mxu0 %v5180_v0 }
 0x211   : > { %v4500_v6 = vpop.f32.mrb[28].mxu0  ;;  %v4511_v56 = vpop.f32.mrb[28].mxu1 }
 0x212   : > { %v4504_v4 = vpop.f32.mrb[29].mxu0  ;;  %5226 = vst [vmem:[#allocation38_spill] sm:$0xff] %v4511_v56  ;;  %v4517_v54 = vpop.f32.mrb[29].mxu1 }
 0x213   : > { %v4509_v33 = vpop.f32.mrb[30].mxu0  ;;  %5227 = vst [vmem:[#allocation39_spill] sm:$0xff] %v4517_v54  ;;  %v4521_v14 = vpop.f32.mrb[30].mxu1  ;;  %v5232_v54 = vmax.f32 %v4352_v8, %v4426_v47  ;;  %v3594_v8 = vld [vmem:[#allocation8 + $0x18] sm:$0xff]   ;;  %v5247_v30 = vmax.f32 %v4406_v37, %v4504_v4  ;;  %v3596_v37 = vld [vmem:[#allocation8 + $0x20] sm:$0xff]  }
 0x214   : > { %v4515_v0 = vpop.f32.mrb[31].mxu0  ;;  %5228 = vst [vmem:[#allocation40_spill] sm:$0xff] %v4521_v14  ;;  %v4523_v51 = vpop.f32.mrb[31].mxu1  ;;  %3210 = vmatpush3.bf16.msra.mxu1 %v3594_v8 }
 0x215   : > { %5229 = vst [vmem:[#allocation41_spill] sm:$0xff] %v4523_v51 }
 0x216   : > { %1555 = vmatmul.mubr.bf16.gmra.mrb[136].mxu0 %v3574_v49  ;;  %v5234_v49 = vmax.f32 %v4355_v10, %v4431_v50  ;;  %v5238_v50 = vmax.f32 %v4368_v16, %v4448_v58  ;;  %v5241_v58 = vmax.f32 %v4377_v21, %v4463_v3  ;;  %v5243_v21 = vmax.f32 %v4388_v26, %v4478_v38 }
 0x217   : > { %1564 = vmatprep.mubr.bf16.mxu0 %v5230_v46 }
 0x219   : > { %v1296_v13 = vpop.f32.mrb[32].mxu0  ;;  %v4537_v14 = vpop.f32.mrb[32].mxu1 }
 0x21a   : > { %v4529_v56 = vmax.f32 %v5231_v11, %v1296_v13  ;;  %v1298_v48 = vpop.f32.mrb[33].mxu0  ;;  %5233 = vst [vmem:[#allocation42_spill] sm:$0xff] %v4537_v14  ;;  %v4544_v11 = vpop.f32.mrb[33].mxu1  ;;  %v5236_v13 = vmax.f32 %v4359_v12, %v4437_v53  ;;  %v3578_v12 = vld [vmem:[%s4221_s21 + $0x120] sm:$0xff]   ;;  %v5239_v53 = vmax.f32 %v4370_v17, %v4452_v60 }
 0x21b   : > { %v4535_v59 = vmax.f32 %v5232_v54, %v1298_v48  ;;  %v1300_v52 = vpop.f32.mrb[34].mxu0  ;;  %5235 = vst [vmem:[#allocation43_spill] sm:$0xff] %v4544_v11  ;;  %v4551_v47 = vpop.f32.mrb[34].mxu1 }
 0x21c   : > { %v4542_v51 = vmax.f32 %v5234_v49, %v1300_v52  ;;  %v1302_v62 = vpop.f32.mrb[35].mxu0  ;;  %5237 = vst [vmem:[#allocation44_spill] sm:$0xff] %v4551_v47  ;;  %v4553_v54 = vpop.f32.mrb[35].mxu1 }
 0x21d   : > { %v4549_v45 = vmax.f32 %v5236_v13, %v1302_v62 }
 0x21e   : > { %1565 = vmatmul.mubr.bf16.gmra.mrb[140].mxu0 %v3576_v55 }
 0x21f   : > { %1574 = vmatprep.mubr.bf16.mxu0 %v5230_v46 }
 0x221   : > { %v1306_v10 = vpop.f32.mrb[36].mxu0  ;;  %v4567_v49 = vpop.f32.mrb[36].mxu1 }
 0x222   : > { %v4559_v52 = vmax.f32 %v5238_v50, %v1306_v10  ;;  %v1308_v48 = vpop.f32.mrb[37].mxu0  ;;  %v4574_v16 = vpop.f32.mrb[37].mxu1 }
 0x223   : > { %v4565_v62 = vmax.f32 %v5239_v53, %v1308_v48  ;;  %v1310_v55 = vpop.f32.mrb[38].mxu0  ;;  %v4581_v50 = vpop.f32.mrb[38].mxu1  ;;  %v3580_v53 = vld [vmem:[%s4221_s21 + $0x128] sm:$0xff]  }
 0x224   : > { %v4572_v13 = vmax.f32 %v5240_v7, %v1310_v55  ;;  %v1312_v8 = vpop.f32.mrb[39].mxu0  ;;  %v4583_v17 = vpop.f32.mrb[39].mxu1  ;;  %v5244_v7 = vmax.f32 %v4391_v28, %v4483_v2  ;;  %v5246_v28 = vmax.f32 %v4404_v36, %v4500_v6  ;;  %v3595_v36 = vld [vmem:[#allocation8 + $0x60] sm:$0xff]  }
 0x225   : > { %v4579_v10 = vmax.f32 %v5241_v58, %v1312_v8  ;;  %3211 = vmatprep.subr.bf16.mxu1 %v3595_v36 }
 0x226   : > { %1575 = vmatmul.mubr.bf16.gmra.mrb[144].mxu0 %v3578_v12  ;;  %3212 = vmatpush3.bf16.msra.mxu1 %v3596_v37 }
 0x227   : > { %1584 = vmatprep.mubr.bf16.mxu0 %v5230_v46 }
 0x229   : > { %v1316_v60 = vpop.f32.mrb[40].mxu0  ;;  %v4597_v12 = vpop.f32.mrb[40].mxu1 }
 0x22a   : > { %v4589_v63 = vmax.f32 %v5242_v19, %v1316_v60  ;;  %v1318_v48 = vpop.f32.mrb[41].mxu0  ;;  %v4604_v25 = vpop.f32.mrb[41].mxu1 }
 0x22b   : > { %v4595_v3 = vmax.f32 %v5243_v21, %v1318_v48  ;;  %v1320_v55 = vpop.f32.mrb[42].mxu0  ;;  %v4611_v19 = vpop.f32.mrb[42].mxu1  ;;  %v3582_v21 = vld [vmem:[%s4221_s21 + $0x130] sm:$0xff]  }
 0x22c   : > { %v4602_v8 = vmax.f32 %v5244_v7, %v1320_v55  ;;  %v1322_v58 = vpop.f32.mrb[43].mxu0  ;;  %v4613_v26 = vpop.f32.mrb[43].mxu1 }
 0x22d   : > { %v4609_v60 = vmax.f32 %v5245_v31, %v1322_v58 }
 0x22e   : > { %1585 = vmatmul.mubr.bf16.gmra.mrb[148].mxu0 %v3580_v53  ;;  %v5248_v53 = vmax.f32 %v4409_v39, %v4509_v33 }
 0x22f   : > { %1594 = vmatprep.mubr.bf16.mxu0 %v5230_v46 }
 0x231   : > { %v1326_v38 = vpop.f32.mrb[44].mxu0  ;;  %v4627_v7 = vpop.f32.mrb[44].mxu1 }
 0x232   : > { %v4619_v2 = vmax.f32 %v5246_v28, %v1326_v38  ;;  %v1328_v48 = vpop.f32.mrb[45].mxu0  ;;  %v4634_v6 = vpop.f32.mrb[45].mxu1  ;;  %v5249_v38 = vmax.f32 %v4413_v41, %v4515_v0 }
 0x233   : > { %v4625_v9 = vmax.f32 %v5247_v30, %v1328_v48  ;;  %v1330_v55 = vpop.f32.mrb[46].mxu0  ;;  %v4641_v4 = vpop.f32.mrb[46].mxu1 }
 0x234   : > { %v4632_v58 = vmax.f32 %v5248_v53, %v1330_v55  ;;  %v1332_v31 = vpop.f32.mrb[47].mxu0  ;;  %v4643_v48 = vpop.f32.mrb[47].mxu1  ;;  %v3584_v55 = vld [vmem:[%s4221_s21 + $0x138] sm:$0xff]   ;;  %s5336_s21 = sld [smem:[#allocation77_spill]] }
 0x235   : > { %v4639_v28 = vmax.f32 %v5249_v38, %v1332_v31 }
 0x236   : > { %1595 = vmatmul.mubr.bf16.gmra.mrb[152].mxu0 %v3582_v21 }
 0x237   : > { %1604 = vmatprep.mubr.bf16.mxu0 %v5230_v46 }
 0x239   : > { %v1336_v39 = vpop.f32.mrb[48].mxu0  ;;  %v4649_v41 = vpop.f32.mrb[48].mxu1 }
 0x23a   : > { %v1887_v33 = vmax.f32 %v4529_v56, %v1336_v39  ;;  %v1338_v30 = vpop.f32.mrb[49].mxu0  ;;  %5250 = vst [vmem:[#allocation45_spill] sm:$0xff] %v4649_v41  ;;  %v4652_v21 = vpop.f32.mrb[49].mxu1 }
 0x23b   : > { %v1888_v53 = vmax.f32 %v4535_v59, %v1338_v30  ;;  %v1340_v0 = vpop.f32.mrb[50].mxu0  ;;  %5251 = vst [vmem:[#allocation46_spill] sm:$0xff] %v4652_v21  ;;  %v4655_v47 = vpop.f32.mrb[50].mxu1 }
 0x23c   : > { %v1889_v31 = vmax.f32 %v4542_v51, %v1340_v0  ;;  %v1342_v38 = vpop.f32.mrb[51].mxu0  ;;  %5252 = vst [vmem:[#allocation47_spill] sm:$0xff] %v4655_v47  ;;  %v4657_v37 = vpop.f32.mrb[51].mxu1 }
 0x23d   : > { %v1890_v36 = vmax.f32 %v4549_v45, %v1342_v38 }
 0x23e   : > { %1605 = vmatmul.mubr.bf16.gmra.mrb[156].mxu0 %v3584_v55 }
 0x241   : > { %v1346_v56 = vpop.f32.mrb[52].mxu0  ;;  %v4661_v41 = vpop.f32.mrb[52].mxu1 }
 0x242   : > { %v1891_v39 = vmax.f32 %v4559_v52, %v1346_v56  ;;  %v1348_v46 = vpop.f32.mrb[53].mxu0  ;;  %v4664_v21 = vpop.f32.mrb[53].mxu1 }
 0x243   : > { %v1892_v59 = vmax.f32 %v4565_v62, %v1348_v46  ;;  %v1350_v30 = vpop.f32.mrb[54].mxu0  ;;  %5253 = vst [vmem:[#allocation48_spill] sm:$0xff] %v4664_v21  ;;  %v4667_v38 = vpop.f32.mrb[54].mxu1 }
 0x244   : > { %v1893_v51 = vmax.f32 %v4572_v13, %v1350_v30  ;;  %v1352_v0 = vpop.f32.mrb[55].mxu0  ;;  %5254 = vst [vmem:[#allocation49_spill] sm:$0xff] %v4667_v38  ;;  %v4669_v55 = vpop.f32.mrb[55].mxu1 }
 0x245   : > { %v1894_v45 = vmax.f32 %v4579_v10, %v1352_v0  ;;  %5255 = vst [vmem:[#allocation50_spill] sm:$0xff] %v4669_v55  ;;  %v3597_v0 = vld [vmem:[#allocation8 + $0x68] sm:$0xff]  }
 0x246   : > { %3213 = vmatprep.subr.bf16.mxu1 %v3597_v0 }
 0x249   : > { %v4671_v47 = vpop.f32.mrb[56].mxu0  ;;  %v4681_v56 = vpop.f32.mrb[56].mxu1 }
 0x24a   : > { %v1895_v52 = vmax.f32 %v4589_v63, %v4671_v47  ;;  %v4675_v46 = vpop.f32.mrb[57].mxu0  ;;  %5256 = vst [vmem:[#allocation51_spill] sm:$0xff] %v4681_v56  ;;  %v4687_v11 = vpop.f32.mrb[57].mxu1  ;;  %v3598_v63 = vld [vmem:[#allocation8 + $0x28] sm:$0xff]  }
 0x24b   : > { %v1896_v62 = vmax.f32 %v4595_v3, %v4675_v46  ;;  %v4679_v13 = vpop.f32.mrb[58].mxu0  ;;  %5257 = vst [vmem:[#allocation52_spill] sm:$0xff] %v4687_v11  ;;  %v4691_v14 = vpop.f32.mrb[58].mxu1  ;;  %3214 = vmatpush3.bf16.msra.mxu1 %v3598_v63 }
 0x24c   : > { %v1897_v10 = vmax.f32 %v4602_v8, %v4679_v13  ;;  %v4685_v30 = vpop.f32.mrb[59].mxu0  ;;  %5258 = vst [vmem:[#allocation53_spill] sm:$0xff] %v4691_v14  ;;  %v4693_v3 = vpop.f32.mrb[59].mxu1 }
 0x24d   : > { %v1898_v47 = vmax.f32 %v4609_v60, %v4685_v30  ;;  %5259 = vst [vmem:[#allocation54_spill] sm:$0xff] %v4693_v3 }
 0x251   : > { %v4695_v46 = vpop.f32.mrb[60].mxu0  ;;  %v4705_v60 = vpop.f32.mrb[60].mxu1 }
 0x252   : > { %v1899_v8 = vmax.f32 %v4619_v2, %v4695_v46  ;;  %v4699_v13 = vpop.f32.mrb[61].mxu0  ;;  %5260 = vst [vmem:[#allocation55_spill] sm:$0xff] %v4705_v60  ;;  %v4711_v63 = vpop.f32.mrb[61].mxu1 }
 0x253   : > { %v1900_v11 = vmax.f32 %v4625_v9, %v4699_v13  ;;  %v4703_v56 = vpop.f32.mrb[62].mxu0  ;;  %5261 = vst [vmem:[#allocation56_spill] sm:$0xff] %v4711_v63  ;;  %v4715_v2 = vpop.f32.mrb[62].mxu1 }
 0x254   : > { %v1901_v30 = vmax.f32 %v4632_v58, %v4703_v56  ;;  %v4709_v0 = vpop.f32.mrb[63].mxu0  ;;  %v4717_v46 = vpop.f32.mrb[63].mxu1 }
 0x255   : > { %v1902_v3 = vmax.f32 %v4639_v28, %v4709_v0  ;;  %5262 = vst [vmem:[#allocation57_spill] sm:$0xff] %v4717_v46 }
 0x259   : > { %v1376_v14 = vpop.f32.mrb[64].mxu0  ;;  %v4723_v38 = vpop.f32.mrb[64].mxu1 }
 0x25a   : > { %v4719_v9 = vmax.f32 %v1887_v33, %v1376_v14  ;;  %v1378_v13 = vpop.f32.mrb[65].mxu0  ;;  %5263 = vst [vmem:[#allocation58_spill] sm:$0xff] %v4723_v38  ;;  %v4727_v63 = vpop.f32.mrb[65].mxu1 }
 0x25b   : > { %v4721_v55 = vmax.f32 %v1888_v53, %v1378_v13  ;;  %v1380_v60 = vpop.f32.mrb[66].mxu0  ;;  %5264 = vst [vmem:[#allocation59_spill] sm:$0xff] %v4727_v63  ;;  %v4731_v28 = vpop.f32.mrb[66].mxu1 }
 0x25c   : > { %v4725_v58 = vmax.f32 %v1889_v31, %v1380_v60  ;;  %v1382_v56 = vpop.f32.mrb[67].mxu0  ;;  %5265 = vst [vmem:[#allocation60_spill] sm:$0xff] %v4731_v28  ;;  %v4733_v0 = vpop.f32.mrb[67].mxu1  ;;  %v3599_v28 = vld [vmem:[#allocation8 + $0x70] sm:$0xff]  }
 0x25d   : > { %v4729_v21 = vmax.f32 %v1890_v36, %v1382_v56  ;;  %5266 = vst [vmem:[#allocation61_spill] sm:$0xff] %v4733_v0  ;;  %3215 = vmatprep.subr.bf16.mxu1 %v3599_v28 }
 0x25f   : > { %v1922_v14 = vmax.f32 %v4729_v21, %v4365_v15  ;;  %v3600_v21 = vld [vmem:[#allocation8 + $0x30] sm:$0xff]  }
 0x260   : > { %3216 = vmatpush3.bf16.msra.mxu1 %v3600_v21 }
 0x261   : > { %v1386_v33 = vpop.f32.mrb[68].mxu0  ;;  %v4741_v60 = vpop.f32.mrb[68].mxu1 }
 0x262   : > { %v4737_v53 = vmax.f32 %v1891_v39, %v1386_v33  ;;  %v1388_v13 = vpop.f32.mrb[69].mxu0  ;;  %v4747_v63 = vpop.f32.mrb[69].mxu1 }
 0x263   : > { %v4739_v46 = vmax.f32 %v1892_v59, %v1388_v13  ;;  %v1390_v31 = vpop.f32.mrb[70].mxu0  ;;  %v4753_v39 = vpop.f32.mrb[70].mxu1 }
 0x264   : > { %v4743_v38 = vmax.f32 %v1893_v51, %v1390_v31  ;;  %v1392_v36 = vpop.f32.mrb[71].mxu0  ;;  %v1923_v56 = vmax.f32 %v4737_v53, %v4375_v20  ;;  %v4757_v51 = vpop.f32.mrb[71].mxu1 }
 0x265   : > { %v4749_v0 = vmax.f32 %v1894_v45, %v1392_v36  ;;  %v1924_v15 = vmax.f32 %v4739_v46, %v4379_v22 }
 0x266   : > { %v1925_v59 = vmax.f32 %v4743_v38, %v4381_v23 }
 0x267   : > { %v1926_v20 = vmax.f32 %v4749_v0, %v4383_v24 }
 0x269   : > { %v1396_v33 = vpop.f32.mrb[72].mxu0  ;;  %v4765_v46 = vpop.f32.mrb[72].mxu1 }
 0x26a   : > { %v4761_v53 = vmax.f32 %v1895_v52, %v1396_v33  ;;  %v1398_v45 = vpop.f32.mrb[73].mxu0  ;;  %v4771_v38 = vpop.f32.mrb[73].mxu1 }
 0x26b   : > { %v4763_v13 = vmax.f32 %v1896_v62, %v1398_v45  ;;  %v1400_v22 = vpop.f32.mrb[74].mxu0  ;;  %v4777_v52 = vpop.f32.mrb[74].mxu1 }
 0x26c   : > { %v4767_v31 = vmax.f32 %v1897_v10, %v1400_v22  ;;  %v1402_v36 = vpop.f32.mrb[75].mxu0  ;;  %v1927_v23 = vmax.f32 %v4761_v53, %v4393_v29  ;;  %v4781_v0 = vpop.f32.mrb[75].mxu1 }
 0x26d   : > { %v4773_v28 = vmax.f32 %v1898_v47, %v1402_v36  ;;  %v1928_v24 = vmax.f32 %v4763_v13, %v4397_v32 }
 0x26e   : > { %v1929_v62 = vmax.f32 %v4767_v31, %v4399_v34 }
 0x26f   : > { %v1930_v10 = vmax.f32 %v4773_v28, %v4401_v35 }
 0x271   : > { %v1406_v21 = vpop.f32.mrb[76].mxu0  ;;  %v4789_v45 = vpop.f32.mrb[76].mxu1 }
 0x272   : > { %v4785_v33 = vmax.f32 %v1899_v8, %v1406_v21  ;;  %v1408_v29 = vpop.f32.mrb[77].mxu0  ;;  %v4795_v22 = vpop.f32.mrb[77].mxu1 }
 0x273   : > { %v4787_v53 = vmax.f32 %v1900_v11, %v1408_v29  ;;  %v1410_v47 = vpop.f32.mrb[78].mxu0  ;;  %5267 = vst [vmem:[#allocation62_spill] sm:$0xff] %v4795_v22  ;;  %v4801_v8 = vpop.f32.mrb[78].mxu1 }
 0x274   : > { %v4791_v32 = vmax.f32 %v1901_v30, %v1410_v47  ;;  %v1412_v13 = vpop.f32.mrb[79].mxu0  ;;  %v1931_v34 = vmax.f32 %v4785_v33, %v4411_v40  ;;  %5268 = vst [vmem:[#allocation63_spill] sm:$0xff] %v4801_v8  ;;  %v4805_v36 = vpop.f32.mrb[79].mxu1 }
 0x275   : > { %v4797_v31 = vmax.f32 %v1902_v3, %v1412_v13  ;;  %v1932_v35 = vmax.f32 %v4787_v53, %v4415_v42  ;;  %5269 = vst [vmem:[#allocation64_spill] sm:$0xff] %v4805_v36  ;;  %v3602_v42 = vld [vmem:[#allocation8 + $0x38] sm:$0xff]  }
 0x276   : > { %v1933_v11 = vmax.f32 %v4791_v32, %v4417_v43 }
 0x277   : > { %v1934_v30 = vmax.f32 %v4797_v31, %v4419_v44  ;;  %v3601_v31 = vld [vmem:[#allocation8 + $0x78] sm:$0xff]  }
 0x278   : > { %3217 = vmatprep.subr.bf16.mxu1 %v3601_v31 }
 0x279   : > { %v4809_v28 = vpop.f32.mrb[80].mxu0  ;;  %v4819_v33 = vpop.f32.mrb[80].mxu1  ;;  %3218 = vmatpush3.bf16.msra.mxu1 %v3602_v42 }
 0x27a   : > { %v4813_v3 = vpop.f32.mrb[81].mxu0  ;;  %5270 = vst [vmem:[#allocation65_spill] sm:$0xff] %v4819_v33  ;;  %v4823_v53 = vpop.f32.mrb[81].mxu1 }
 0x27b   : > { %v4817_v21 = vpop.f32.mrb[82].mxu0  ;;  %5271 = vst [vmem:[#allocation66_spill] sm:$0xff] %v4823_v53  ;;  %v4827_v47 = vpop.f32.mrb[82].mxu1 }
 0x27c   : > { %v1422_v29 = vpop.f32.mrb[83].mxu0  ;;  %5272 = vst [vmem:[#allocation67_spill] sm:$0xff] %v4827_v47  ;;  %v4829_v32 = vpop.f32.mrb[83].mxu1 }
 0x27d   : > { %v4825_v44 = vmax.f32 %v1922_v14, %v1422_v29  ;;  %5273 = vst [vmem:[#allocation68_spill] sm:$0xff] %v4829_v32 }
 0x27f   : > { %v1954_v13 = vmax.f32 %v4825_v44, %v4445_v57 }
 0x281   : > { %v1426_v40 = vpop.f32.mrb[84].mxu0  ;;  %v4833_v22 = vpop.f32.mrb[84].mxu1 }
 0x282   : > { %v1939_v36 = vmax.f32 %v1923_v56, %v1426_v40  ;;  %v1428_v33 = vpop.f32.mrb[85].mxu0  ;;  %5274 = vst [vmem:[#allocation69_spill] sm:$0xff] %v4833_v22  ;;  %v4836_v53 = vpop.f32.mrb[85].mxu1 }
 0x283   : > { %v1940_v8 = vmax.f32 %v1924_v15, %v1428_v33  ;;  %v1430_v43 = vpop.f32.mrb[86].mxu0  ;;  %v4839_v44 = vpop.f32.mrb[86].mxu1 }
 0x284   : > { %v1941_v14 = vmax.f32 %v1925_v59, %v1430_v43  ;;  %v1432_v29 = vpop.f32.mrb[87].mxu0  ;;  %v1955_v47 = vmax.f32 %v1939_v36, %v4459_v1  ;;  %5275 = vst [vmem:[#allocation70_spill] sm:$0xff] %v4839_v44  ;;  %v4843_v15 = vpop.f32.mrb[87].mxu1 }
 0x285   : > { %v1942_v32 = vmax.f32 %v1926_v20, %v1432_v29  ;;  %v1956_v57 = vmax.f32 %v1940_v8, %v4465_v5  ;;  %v5277_v8 = vld [vmem:[#allocation35_spill] sm:$0xff] }
 0x286   : > { %v1957_v56 = vmax.f32 %v1941_v14, %v4469_v18  ;;  %v5279_v18 = vld [vmem:[#allocation36_spill] sm:$0xff]  ;;  %v5281_v14 = vld [vmem:[#allocation37_spill] sm:$0xff] }
 0x287   : > { %v1958_v40 = vmax.f32 %v1942_v32, %v4471_v27 }
 0x289   : > { %v1436_v42 = vpop.f32.mrb[88].mxu0  ;;  %v4846_v20 = vpop.f32.mrb[88].mxu1 }
 0x28a   : > { %v1943_v33 = vmax.f32 %v1927_v23, %v1436_v42  ;;  %v1438_v31 = vpop.f32.mrb[89].mxu0  ;;  %5276 = vst [vmem:[#allocation71_spill] sm:$0xff] %v4846_v20  ;;  %v4849_v44 = vpop.f32.mrb[89].mxu1 }
 0x28b   : > { %v1944_v59 = vmax.f32 %v1928_v24, %v1438_v31  ;;  %v1440_v43 = vpop.f32.mrb[90].mxu0  ;;  %5278 = vst [vmem:[#allocation35_spill] sm:$0xff] %v4849_v44  ;;  %v4852_v32 = vpop.f32.mrb[90].mxu1  ;;  %v5284_v44 = vld [vmem:[#allocation39_spill] sm:$0xff] }
 0x28c   : > { %v1945_v22 = vmax.f32 %v1929_v62, %v1440_v43  ;;  %v1442_v1 = vpop.f32.mrb[91].mxu0  ;;  %v1959_v36 = vmax.f32 %v1943_v33, %v4485_v61  ;;  %5280 = vst [vmem:[#allocation36_spill] sm:$0xff] %v4852_v32  ;;  %v4855_v42 = vpop.f32.mrb[91].mxu1  ;;  %v5285_v32 = vld [vmem:[#allocation40_spill] sm:$0xff] }
 0x28d   : > { %v1946_v5 = vmax.f32 %v1930_v10, %v1442_v1  ;;  %v1960_v29 = vmax.f32 %v1944_v59, %v5277_v8  ;;  %5282 = vst [vmem:[#allocation37_spill] sm:$0xff] %v4855_v42  ;;  %v5283_v10 = vld [vmem:[#allocation38_spill] sm:$0xff]  ;;  %v5286_v42 = vld [vmem:[#allocation41_spill] sm:$0xff] }
 0x28e   : > { %v1961_v27 = vmax.f32 %v1945_v22, %v5279_v18 }
 0x28f   : > { %v1962_v23 = vmax.f32 %v1946_v5, %v5281_v14 }
 0x291   : > { %v1446_v24 = vpop.f32.mrb[92].mxu0  ;;  %v4858_v59 = vpop.f32.mrb[92].mxu1 }
 0x292   : > { %v1947_v62 = vmax.f32 %v1931_v34, %v1446_v24  ;;  %v1448_v31 = vpop.f32.mrb[93].mxu0  ;;  %v4861_v18 = vpop.f32.mrb[93].mxu1 }
 0x293   : > { %v1948_v43 = vmax.f32 %v1932_v35, %v1448_v31  ;;  %v1450_v61 = vpop.f32.mrb[94].mxu0  ;;  %v4864_v14 = vpop.f32.mrb[94].mxu1 }
 0x294   : > { %v1949_v33 = vmax.f32 %v1933_v11, %v1450_v61  ;;  %v1452_v20 = vpop.f32.mrb[95].mxu0  ;;  %v1963_v1 = vmax.f32 %v1947_v62, %v5283_v10  ;;  %v4867_v24 = vpop.f32.mrb[95].mxu1  ;;  %v5288_v11 = vmax.f32 %v4719_v9, %v4809_v28 }
 0x295   : > { %v1950_v8 = vmax.f32 %v1934_v30, %v1452_v20  ;;  %v1964_v22 = vmax.f32 %v1948_v43, %v5284_v44  ;;  %5287 = vst [vmem:[#allocation38_spill] sm:$0xff] %v4867_v24  ;;  %v5289_v30 = vmax.f32 %v4721_v55, %v4813_v3 }
 0x296   : > { %v1965_v5 = vmax.f32 %v1949_v33, %v5285_v32  ;;  %v5290_v32 = vmax.f32 %v4725_v58, %v4817_v21 }
 0x297   : > { %v1966_v34 = vmax.f32 %v1950_v8, %v5286_v42 }
 0x299   : > { %v1456_v35 = vpop.f32.mrb[96].mxu0 }
 0x29a   : > { %v4872_v62 = vmax.f32 %v5288_v11, %v1456_v35  ;;  %v1458_v31 = vpop.f32.mrb[97].mxu0 }
 0x29b   : > { %v4877_v44 = vmax.f32 %v5289_v30, %v1458_v31  ;;  %v1460_v20 = vpop.f32.mrb[98].mxu0 }
 0x29c   : > { %v4882_v43 = vmax.f32 %v5290_v32, %v1460_v20  ;;  %v1462_v42 = vpop.f32.mrb[99].mxu0 }
 0x29d   : > { %v1970_v61 = vmax.f32 %v1954_v13, %v1462_v42 }
 0x29f   : > { %v1986_v33 = vmax.f32 %v1970_v61, %v4553_v54  ;;  %v4889_v54 = vld [vmem:[#allocation10] sm:$0xff]  }
 0x2a0   : > { %3311 = vmatprep.subr.bf16.mxu1 %v4889_v54 }
 0x2a1   : > { %v1466_v10 = vpop.f32.mrb[100].mxu0 }
 0x2a2   : > { %v1971_v9 = vmax.f32 %v1955_v47, %v1466_v10  ;;  %v1468_v28 = vpop.f32.mrb[101].mxu0 }
 0x2a3   : > { %v1972_v8 = vmax.f32 %v1956_v57, %v1468_v28  ;;  %v1470_v35 = vpop.f32.mrb[102].mxu0 }
 0x2a4   : > { %v1973_v11 = vmax.f32 %v1957_v56, %v1470_v35  ;;  %v1472_v24 = vpop.f32.mrb[103].mxu0  ;;  %v1987_v55 = vmax.f32 %v1971_v9, %v4567_v49 }
 0x2a5   : > { %v1974_v3 = vmax.f32 %v1958_v40, %v1472_v24  ;;  %v1988_v31 = vmax.f32 %v1972_v8, %v4574_v16 }
 0x2a6   : > { %v1989_v58 = vmax.f32 %v1973_v11, %v4581_v50 }
 0x2a7   : > { %v1990_v21 = vmax.f32 %v1974_v3, %v4583_v17 }
 0x2a9   : > { %v1476_v30 = vpop.f32.mrb[104].mxu0 }
 0x2aa   : > { %v1975_v13 = vmax.f32 %v1959_v36, %v1476_v30  ;;  %v1478_v20 = vpop.f32.mrb[105].mxu0 }
 0x2ab   : > { %v1976_v47 = vmax.f32 %v1960_v29, %v1478_v20  ;;  %v1480_v32 = vpop.f32.mrb[106].mxu0 }
 0x2ac   : > { %v1977_v57 = vmax.f32 %v1961_v27, %v1480_v32  ;;  %v1482_v42 = vpop.f32.mrb[107].mxu0  ;;  %v1991_v56 = vmax.f32 %v1975_v13, %v4597_v12 }
 0x2ad   : > { %v1978_v49 = vmax.f32 %v1962_v23, %v1482_v42  ;;  %v1992_v16 = vmax.f32 %v1976_v47, %v4604_v25  ;;  %v5291_v47 = vld [vmem:[#allocation48_spill] sm:$0xff]  ;;  %v5293_v42 = vld [vmem:[#allocation50_spill] sm:$0xff] }
 0x2ae   : > { %v1993_v50 = vmax.f32 %v1977_v57, %v4611_v19 }
 0x2af   : > { %v1994_v17 = vmax.f32 %v1978_v49, %v4613_v26 }
 0x2b1   : > { %v1486_v40 = vpop.f32.mrb[108].mxu0 }
 0x2b2   : > { %v1979_v36 = vmax.f32 %v1963_v1, %v1486_v40  ;;  %v1488_v24 = vpop.f32.mrb[109].mxu0 }
 0x2b3   : > { %v1980_v61 = vmax.f32 %v1964_v22, %v1488_v24  ;;  %v1490_v10 = vpop.f32.mrb[110].mxu0 }
 0x2b4   : > { %v1981_v29 = vmax.f32 %v1965_v5, %v1490_v10  ;;  %v1492_v9 = vpop.f32.mrb[111].mxu0  ;;  %v1995_v27 = vmax.f32 %v1979_v36, %v4627_v7  ;;  %v5295_v10 = vld [vmem:[#allocation52_spill] sm:$0xff] }
 0x2b5   : > { %v1982_v28 = vmax.f32 %v1966_v34, %v1492_v9  ;;  %v1996_v12 = vmax.f32 %v1980_v61, %v4634_v6  ;;  %v5297_v9 = vld [vmem:[#allocation54_spill] sm:$0xff] }
 0x2b6   : > { %v1997_v23 = vmax.f32 %v1981_v29, %v4641_v4 }
 0x2b7   : > { %v1998_v25 = vmax.f32 %v1982_v28, %v4643_v48 }
 0x2b9   : > { %v1496_v8 = vpop.f32.mrb[112].mxu0 }
 0x2ba   : > { %v1951_v19 = vmax.f32 %v4872_v62, %v1496_v8  ;;  %v1498_v26 = vpop.f32.mrb[113].mxu0 }
 0x2bb   : > { %v1952_v1 = vmax.f32 %v4877_v44, %v1498_v26  ;;  %v1500_v35 = vpop.f32.mrb[114].mxu0  ;;  %v5292_v44 = vld [vmem:[#allocation49_spill] sm:$0xff] }
 0x2bc   : > { %v1953_v22 = vmax.f32 %v4882_v43, %v1500_v35  ;;  %v1502_v5 = vpop.f32.mrb[115].mxu0 }
 0x2bd   : > { %v2002_v11 = vmax.f32 %v1986_v33, %v1502_v5 }
 0x2bf   : > { %v2018_v7 = vmax.f32 %v2002_v11, %v4657_v37 }
 0x2c1   : > { %v1506_v34 = vpop.f32.mrb[116].mxu0 }
 0x2c2   : > { %v2003_v3 = vmax.f32 %v1987_v55, %v1506_v34  ;;  %v1508_v6 = vpop.f32.mrb[117].mxu0 }
 0x2c3   : > { %v2004_v30 = vmax.f32 %v1988_v31, %v1508_v6  ;;  %v1510_v4 = vpop.f32.mrb[118].mxu0  ;;  %v5294_v31 = vld [vmem:[#allocation51_spill] sm:$0xff]  ;;  %v5299_v6 = vld [vmem:[#allocation56_spill] sm:$0xff] }
 0x2c4   : > { %v2005_v13 = vmax.f32 %v1989_v58, %v1510_v4  ;;  %v1512_v48 = vpop.f32.mrb[119].mxu0  ;;  %v2019_v20 = vmax.f32 %v2003_v3, %v4661_v41  ;;  %v5296_v41 = vld [vmem:[#allocation53_spill] sm:$0xff] }
 0x2c5   : > { %v2006_v62 = vmax.f32 %v1990_v21, %v1512_v48  ;;  %v2020_v32 = vmax.f32 %v2004_v30, %v5291_v47  ;;  %v5300_v4 = vld [vmem:[#allocation57_spill] sm:$0xff] }
 0x2c6   : > { %v2021_v57 = vmax.f32 %v2005_v13, %v5292_v44 }
 0x2c7   : > { %v2022_v43 = vmax.f32 %v2006_v62, %v5293_v42 }
 0x2c9   : > { %v1516_v49 = vpop.f32.mrb[120].mxu0 }
 0x2ca   : > { %v2007_v33 = vmax.f32 %v1991_v56, %v1516_v49  ;;  %v1518_v40 = vpop.f32.mrb[121].mxu0 }
 0x2cb   : > { %v2008_v37 = vmax.f32 %v1992_v16, %v1518_v40  ;;  %v1520_v36 = vpop.f32.mrb[122].mxu0  ;;  %v5298_v16 = vld [vmem:[#allocation55_spill] sm:$0xff] }
 0x2cc   : > { %v2009_v55 = vmax.f32 %v1993_v50, %v1520_v36  ;;  %v1522_v24 = vpop.f32.mrb[123].mxu0  ;;  %v2023_v61 = vmax.f32 %v2007_v33, %v5294_v31  ;;  %v5301_v33 = vld [vmem:[#allocation61_spill] sm:$0xff] }
 0x2cd   : > { %v2010_v58 = vmax.f32 %v1994_v17, %v1522_v24  ;;  %v2024_v29 = vmax.f32 %v2008_v37, %v5295_v10 }
 0x2ce   : > { %v2025_v21 = vmax.f32 %v2009_v55, %v5296_v41 }
 0x2cf   : > { %v2026_v28 = vmax.f32 %v2010_v58, %v5297_v9 }
 0x2d1   : > { %v1526_v8 = vpop.f32.mrb[124].mxu0 }
 0x2d2   : > { %v2011_v26 = vmax.f32 %v1995_v27, %v1526_v8  ;;  %v1528_v35 = vpop.f32.mrb[125].mxu0  ;;  %v2097_v8 = vlaneseq }
 0x2d3   : > { %v2012_v5 = vmax.f32 %v1996_v12, %v1528_v35  ;;  %v1530_v11 = vpop.f32.mrb[126].mxu0 }
 0x2d4   : > { %v2013_v56 = vmax.f32 %v1997_v23, %v1530_v11  ;;  %v1532_v34 = vpop.f32.mrb[127].mxu0  ;;  %v2027_v3 = vmax.f32 %v2011_v26, %v5298_v16  ;;  %v5302_v16 = vld [vmem:[#allocation62_spill] sm:$0xff] }
 0x2d5   : > { %v2014_v50 = vmax.f32 %v1998_v25, %v1532_v34  ;;  %v2028_v30 = vmax.f32 %v2012_v5, %v5299_v6  ;;  %v4958_v6 = vshrl.u32 %v2097_v8, 7  ;;  %v5310_v8 = vld [vmem:[#allocation33_spill] sm:$0xff] }
 0x2d6   : > { %v2029_v17 = vmax.f32 %v2013_v56, %v4715_v2 }
 0x2d7   : > { %v2030_v13 = vmax.f32 %v2014_v50, %v5300_v4  ;;  %v5303_v4 = vld [vmem:[#allocation63_spill] sm:$0xff] }
 0x2d9   : > { %v1536_v48 = vpop.f32.mrb[128].mxu0 }
 0x2da   : > { %v1967_v62 = vmax.f32 %v1951_v19, %v1536_v48  ;;  %v1538_v47 = vpop.f32.mrb[129].mxu0  ;;  %v5304_v48 = vld [vmem:[#allocation64_spill] sm:$0xff] }
 0x2db   : > { %v1968_v44 = vmax.f32 %v1952_v1, %v1538_v47  ;;  %v1540_v42 = vpop.f32.mrb[130].mxu0 }
 0x2dc   : > { %v1969_v27 = vmax.f32 %v1953_v22, %v1540_v42  ;;  %v1542_v49 = vpop.f32.mrb[131].mxu0 }
 0x2dd   : > { %v2034_v12 = vmax.f32 %v2018_v7, %v1542_v49 }
 0x2df   : > { %v2050_v23 = vmax.f32 %v2034_v12, %v5301_v33 }
 0x2e1   : > { %v1546_v40 = vpop.f32.mrb[132].mxu0 }
 0x2e2   : > { %v2035_v37 = vmax.f32 %v2019_v20, %v1546_v40  ;;  %v1548_v36 = vpop.f32.mrb[133].mxu0  ;;  %v5306_v40 = vld [vmem:[#allocation29_spill] sm:$0xff] }
 0x2e3   : > { %v4917_v25 = vmax.f32 %v2020_v32, %v1548_v36  ;;  %v1550_v55 = vpop.f32.mrb[134].mxu0 }
 0x2e4   : > { %v4919_v24 = vmax.f32 %v2021_v57, %v1550_v55  ;;  %v1552_v2 = vpop.f32.mrb[135].mxu0  ;;  %v2051_v31 = vmax.f32 %v2035_v37, %v4741_v60  ;;  %v5307_v55 = vld [vmem:[#allocation30_spill] sm:$0xff] }
 0x2e5   : > { %v4922_v19 = vmax.f32 %v2022_v43, %v1552_v2  ;;  %v2052_v1 = vmax.f32 %v4917_v25, %v4747_v63 }
 0x2e6   : > { %v2053_v22 = vmax.f32 %v4919_v24, %v4753_v39 }
 0x2e7   : > { %v2054_v7 = vmax.f32 %v4922_v19, %v4757_v51 }
 0x2e9   : > { %v1556_v20 = vpop.f32.mrb[136].mxu0 }
 0x2ea   : > { %v4930_v32 = vmax.f32 %v2023_v61, %v1556_v20  ;;  %v1558_v58 = vpop.f32.mrb[137].mxu0 }
 0x2eb   : > { %v4932_v57 = vmax.f32 %v2024_v29, %v1558_v58  ;;  %v1560_v10 = vpop.f32.mrb[138].mxu0  ;;  %v5308_v58 = vld [vmem:[#allocation32_spill] sm:$0xff] }
 0x2ec   : > { %v4934_v41 = vmax.f32 %v2025_v21, %v1560_v10  ;;  %v1562_v60 = vpop.f32.mrb[139].mxu0  ;;  %v2055_v43 = vmax.f32 %v4930_v32, %v4765_v46  ;;  %v5309_v10 = vld [vmem:[#allocation31_spill] sm:$0xff] }
 0x2ed   : > { %v4938_v63 = vmax.f32 %v2026_v28, %v1562_v60  ;;  %v2056_v39 = vmax.f32 %v4932_v57, %v4771_v38  ;;  %v5327_v38 = vld [vmem:[#allocation71_spill] sm:$0xff] }
 0x2ee   : > { %v2057_v9 = vmax.f32 %v4934_v41, %v4777_v52 }
 0x2ef   : > { %v2058_v61 = vmax.f32 %v4938_v63, %v4781_v0 }
 0x2f1   : > { %v1566_v29 = vpop.f32.mrb[140].mxu0 }
 0x2f2   : > { %v4946_v26 = vmax.f32 %v2027_v3, %v1566_v29  ;;  %v1568_v21 = vpop.f32.mrb[141].mxu0  ;;  %v2099_v29 = vsub.s32 0, %v4958_v6 }
 0x2f3   : > { %v4948_v35 = vmax.f32 %v2028_v30, %v1568_v21  ;;  %v1570_v5 = vpop.f32.mrb[142].mxu0  ;;  %v5311_v21 = vld [vmem:[#allocation68_spill] sm:$0xff] }
 0x2f4   : > { %v4950_v11 = vmax.f32 %v2029_v17, %v1570_v5  ;;  %v1572_v28 = vpop.f32.mrb[143].mxu0  ;;  %v2059_v56 = vmax.f32 %v4946_v26, %v4789_v45  ;;  %v2103_v17 = vsub.s32 1, %v4958_v6 }
 0x2f5   : > { %v4954_v34 = vmax.f32 %v2030_v13, %v1572_v28  ;;  %v2060_v50 = vmax.f32 %v4948_v35, %v5302_v16  ;;  %v2095_v13 = vld [vmem:[%s5305_s18] sm:$0x3]  ;;  %v5312_v28 = vld [vmem:[#allocation34_spill] sm:$0xff]  ;;  %s5338_s18 = sld [smem:[#allocation78_spill]] }
 0x2f6   : > { %v2061_v3 = vmax.f32 %v4950_v11, %v5303_v4  ;;  %v4972_v20 = vrot.slane %v2095_v13, %v2103_v17 }
 0x2f7   : > { %v2062_v30 = vmax.f32 %v4954_v34, %v5304_v48  ;;  %v3606_v48 = vld [vmem:[#allocation10 + $0x18] sm:$0xff]  }
 0x2f9   : > { %v1576_v47 = vpop.f32.mrb[144].mxu0 }
 0x2fa   : > { %v1983_v42 = vmax.f32 %v1967_v62, %v1576_v47  ;;  %v1578_v49 = vpop.f32.mrb[145].mxu0  ;;  %v5313_v47 = vld [vmem:[#allocation42_spill] sm:$0xff] }
 0x2fb   : > { %v1984_v12 = vmax.f32 %v1968_v44, %v1578_v49  ;;  %v1580_v33 = vpop.f32.mrb[146].mxu0 }
 0x2fc   : > { %v1999_v37 = vmax.f32 %v1983_v42, %v5306_v40  ;;  %v1985_v36 = vmax.f32 %v1969_v27, %v1580_v33  ;;  %v1582_v25 = vpop.f32.mrb[147].mxu0 }
 0x2fd   : > { %v2000_v24 = vmax.f32 %v1984_v12, %v5307_v55  ;;  %v2066_v2 = vmax.f32 %v2050_v23, %v1582_v25  ;;  %v5314_v23 = vld [vmem:[#allocation43_spill] sm:$0xff] }
 0x2fe   : > { %v2015_v62 = vmax.f32 %v1999_v37, %v5308_v58  ;;  %v2001_v60 = vmax.f32 %v1985_v36, %v5309_v10  ;;  %v5315_v37 = vld [vmem:[#allocation45_spill] sm:$0xff]  ;;  %v4986_v36 = vrot.slane %v2095_v13, %v2099_v29 }
 0x2ff   : > { %v2016_v44 = vmax.f32 %v2000_v24, %v5310_v8  ;;  %v2082_v5 = vmax.f32 %v2066_v2, %v5311_v21  ;;  %v5316_v24 = vld [vmem:[#allocation44_spill] sm:$0xff]  ;;  %v5318_v8 = vld [vmem:[#allocation58_spill] sm:$0xff] }
 0x300   : > { %v2017_v27 = vmax.f32 %v2001_v60, %v5312_v28  ;;  %v2031_v42 = vmax.f32 %v2015_v62, %v5313_v47  ;;  %v5317_v60 = vld [vmem:[#allocation46_spill] sm:$0xff]  ;;  %v5320_v47 = vld [vmem:[#allocation69_spill] sm:$0xff] }
 0x301   : > { %v1586_v49 = vpop.f32.mrb[148].mxu0  ;;  %v2032_v12 = vmax.f32 %v2016_v44, %v5314_v23  ;;  %v2110_v33 = vadd.f32 %v4972_v20, %v2082_v5 }
 0x302   : > { %v2067_v40 = vmax.f32 %v2051_v31, %v1586_v49  ;;  %v1588_v25 = vpop.f32.mrb[149].mxu0  ;;  %v2047_v55 = vmax.f32 %v2031_v42, %v5315_v37  ;;  %v2033_v2 = vmax.f32 %v2017_v27, %v5316_v24  ;;  %v5319_v31 = vld [vmem:[#allocation47_spill] sm:$0xff]  ;;  %v5323_v37 = vld [vmem:[#allocation60_spill] sm:$0xff] }
 0x303   : > { %v2068_v58 = vmax.f32 %v2052_v1, %v1588_v25  ;;  %v1590_v10 = vpop.f32.mrb[150].mxu0  ;;  %v2048_v62 = vmax.f32 %v2032_v12, %v5317_v60  ;;  %v5321_v49 = vld [vmem:[#allocation59_spill] sm:$0xff]  ;;  %v2126_v1 = vmax.f32 %v2110_v33, 0.0  ;;  %v5322_v12 = vld [vmem:[#allocation65_spill] sm:$0xff] }
 0x304   : > { %v2063_v44 = vmax.f32 %v2047_v55, %v5318_v8  ;;  %v2069_v21 = vmax.f32 %v2053_v22, %v1590_v10  ;;  %v1592_v5 = vpop.f32.mrb[151].mxu0  ;;  %v2049_v28 = vmax.f32 %v2033_v2, %v5319_v31  ;;  %v2083_v42 = vmax.f32 %v2067_v40, %v5320_v47  ;;  %v2142_v55 = vld [vmem:[%s4229_s16 + $0x18] sm:$0xff]  ;;  %v5324_v2 = vld [vmem:[#allocation70_spill] sm:$0xff] }
 0x305   : > { %v2064_v23 = vmax.f32 %v2048_v62, %v5321_v49  ;;  %v2070_v13 = vmax.f32 %v2054_v7, %v1592_v5  ;;  %v2084_v27 = vmax.f32 %v2068_v58, %v4836_v53  ;;  %v5325_v10 = vld [vmem:[#allocation66_spill] sm:$0xff]  ;;  %v2143_v62 = vld [vmem:[%s4229_s16 + $0x20] sm:$0xff]  ;;  %v5326_v53 = vld [vmem:[#allocation67_spill] sm:$0xff]  ;;  %v2158_v31 = vmul.f32 %v2142_v55, %v2126_v1 }
 0x306   : > { %v2079_v25 = vmax.f32 %v2063_v44, %v5322_v12  ;;  %v2065_v22 = vmax.f32 %v2049_v28, %v5323_v37  ;;  %v2111_v24 = vadd.f32 %v4986_v36, %v2083_v42  ;;  %v2085_v40 = vmax.f32 %v2069_v21, %v5324_v2  ;;  %v2144_v8 = vld [vmem:[%s4229_s16 + $0x28] sm:$0xff]  ;;  %v2139_v5 = vld [vmem:[%s4229_s16] sm:$0xff] }
 0x307   : > { %v2080_v60 = vmax.f32 %v2064_v23, %v5325_v10  ;;  %v2112_v51 = vadd.f32 %v4972_v20, %v2084_v27  ;;  %v2086_v19 = vmax.f32 %v2070_v13, %v4843_v15  ;;  %v2140_v49 = vld [vmem:[%s4229_s16 + $0x8] sm:$0xff] }
 0x308   : > { %v2107_v7 = vadd.f32 %v4986_v36, %v2079_v25  ;;  %v2081_v33 = vmax.f32 %v2065_v22, %v5326_v53  ;;  %v2127_v58 = vmax.f32 %v2111_v24, 0.0  ;;  %v2113_v44 = vadd.f32 %v4986_v36, %v2085_v40  ;;  %v2145_v25 = vld [vmem:[%s4229_s16 + $0x30] sm:$0xff]  ;;  %v2146_v40 = vld [vmem:[%s4229_s16 + $0x38] sm:$0xff] }
 0x309   : > { %v2108_v21 = vadd.f32 %v4972_v20, %v2080_v60  ;;  %v1596_v28 = vpop.f32.mrb[152].mxu0  ;;  %v2128_v47 = vmax.f32 %v2112_v51, 0.0  ;;  %v2114_v42 = vadd.f32 %v4972_v20, %v2086_v19  ;;  %v2141_v22 = vld [vmem:[%s4229_s16 + $0x10] sm:$0xff] }
 0x30a   : > { %v2123_v15 = vmax.f32 %v2107_v7, 0.0  ;;  %v2109_v23 = vadd.f32 %v4986_v36, %v2081_v33  ;;  %v2071_v13 = vmax.f32 %v2055_v43, %v1596_v28  ;;  %v1598_v27 = vpop.f32.mrb[153].mxu0  ;;  %v5019_v12 = vmul.f32 %v2143_v62, %v2127_v58  ;;  %v5328_v53 = vld [vmem:[#allocation35_spill] sm:$0xff]  ;;  %v5329_v58 = vld [vmem:[#allocation36_spill] sm:$0xff]  ;;  %v3604_v28 = vld [vmem:[#allocation10 + $0x8] sm:$0xff]  }
 0x30b   : > { %v2124_v37 = vmax.f32 %v2108_v21, 0.0  ;;  %v2072_v1 = vmax.f32 %v2056_v39, %v1598_v27  ;;  %v1600_v55 = vpop.f32.mrb[154].mxu0  ;;  %v2160_v24 = vmul.f32 %v2144_v8, %v2128_v47  ;;  %v2129_v2 = vmax.f32 %v2113_v44, 0.0 }
 0x30c   : > { %v2155_v10 = vmul.f32 %v2139_v5, %v2123_v15  ;;  %v2125_v60 = vmax.f32 %v2109_v23, 0.0  ;;  %v2073_v46 = vmax.f32 %v2057_v9, %v1600_v55  ;;  %v1602_v32 = vpop.f32.mrb[155].mxu0  ;;  %v2130_v43 = vmax.f32 %v2114_v42, 0.0  ;;  %v5330_v9 = vld [vmem:[#allocation37_spill] sm:$0xff] }
 0x30d   : > { %v2156_v62 = vmul.f32 %v2140_v49, %v2124_v37  ;;  %v2074_v51 = vmax.f32 %v2058_v61, %v1602_v32  ;;  %v2161_v19 = vmul.f32 %v2145_v25, %v2129_v2  ;;  %v2087_v57 = vmax.f32 %v2071_v13, %v5327_v38  ;;  %v2147_v15 = vld [vmem:[%s4229_s16 + $0x40] sm:$0xff]  ;;  %v2149_v49 = vld [vmem:[%s4229_s16 + $0x50] sm:$0xff]  ;;  %v2150_v37 = vld [vmem:[%s4229_s16 + $0x58] sm:$0xff] }
 0x30e   : > { %v2157_v39 = vmul.f32 %v2141_v22, %v2125_v60  ;;  %v2162_v7 = vmul.f32 %v2146_v40, %v2130_v43  ;;  %v2088_v33 = vmax.f32 %v2072_v1, %v5328_v53  ;;  %v2089_v8 = vmax.f32 %v2073_v46, %v5329_v58  ;;  %v3605_v40 = vld [vmem:[#allocation10 + $0x10] sm:$0xff]   ;;  %v3607_v58 = vld [vmem:[#allocation10 + $0x20] sm:$0xff]  }
 0x30f   : > { %v2115_v52 = vadd.f32 %v4986_v36, %v2087_v57  ;;  %v2172_v41 = vpack.c.bf16 %v2158_v31, %v2156_v62  ;;  %v2090_v44 = vmax.f32 %v2074_v51, %v5330_v9  ;;  %v2173_v0 = vpack.c.bf16 %v2161_v19, %v5019_v12  ;;  %v2148_v12 = vld [vmem:[%s4229_s16 + $0x48] sm:$0xff]  ;;  %v2153_v43 = vld [vmem:[%s4229_s16 + $0x70] sm:$0xff]  ;;  %v2154_v19 = vld [vmem:[%s4229_s16 + $0x78] sm:$0xff] }
 0x310   : > { %v2171_v63 = vpack.c.bf16 %v2157_v39, %v2155_v10  ;;  %v2116_v61 = vadd.f32 %v4972_v20, %v2088_v33  ;;  %v2117_v5 = vadd.f32 %v4986_v36, %v2089_v8  ;;  %v2174_v21 = vpack.c.bf16 %v2162_v7, %v2160_v24  ;;  %v2152_v51 = vld [vmem:[%s4229_s16 + $0x68] sm:$0xff]  ;;  %v3609_v8 = vld [vmem:[#allocation10 + $0x30] sm:$0xff]  }
 0x311   : > { %v1606_v47 = vpop.f32.mrb[156].mxu0  ;;  %v2131_v42 = vmax.f32 %v2115_v52, 0.0  ;;  %2346 = vmatprep.mubr.bf16.mxu1 %v2172_v41  ;;  %v2118_v31 = vadd.f32 %v4972_v20, %v2090_v44  ;;  %v3610_v52 = vld [vmem:[#allocation10 + $0x38] sm:$0xff]   ;;  %v3613_v41 = vld [vmem:[#allocation11 + $0x4] ss:$8 sps:$4 sm:$0xff]  }
 0x312   : > { %v2075_v23 = vmax.f32 %v2059_v56, %v1606_v47  ;;  %v1608_v13 = vpop.f32.mrb[157].mxu0  ;;  %v2132_v27 = vmax.f32 %v2116_v61, 0.0  ;;  %v2133_v25 = vmax.f32 %v2117_v5, 0.0  ;;  %2347 = vmatmul.mubr.bf16.vlgmr.msra.gmra.mrb[96].mxu1 %v2171_v63  ;;  %v3151_v44 = vld [vmem:[%s5332_s30] ss:$0 sm:$0xff]  ;;  %s3803_s30 = scalar_lea.vmem %s5102_s5, 1024 }
 0x313   : > { %v2076_v22 = vmax.f32 %v2060_v50, %v1608_v13  ;;  %v1610_v1 = vpop.f32.mrb[158].mxu0  ;;  %v2134_v55 = vmax.f32 %v2118_v31, 0.0  ;;  %2354 = vmatprep.mubr.bf16.mxu1 %v2174_v21  ;;  %3312 = vmatpush3.bf16.msra.mxu1 %v4889_v54  ;;  %v2163_v24 = vmul.f32 %v2147_v15, %v2131_v42  ;;  %p3804_p1 = scmp.ne.s32.totalorder %s5102_s5, %s3803_s30 }
 0x314   : > { %v2077_v45 = vmax.f32 %v2061_v3, %v1610_v1  ;;  %v1612_v26 = vpop.f32.mrb[159].mxu0  ;;  %v2165_v56 = vmul.f32 %v2149_v49, %v2133_v25  ;;  %v2091_v2 = vmax.f32 %v2075_v23, %v4858_v59  ;;  %3313 = vmatprep.subr.bf16.mxu1 %v3604_v28  ;;  %v2164_v10 = vmul.f32 %v2148_v12, %v2132_v27  ;;  %v5331_v3 = vld [vmem:[#allocation38_spill] sm:$0xff] }
 0x315   : > { %v2078_v35 = vmax.f32 %v2062_v30, %v1612_v26  ;;  %v2166_v16 = vmul.f32 %v2150_v37, %v2134_v55  ;;  %v2092_v54 = vmax.f32 %v2076_v22, %v4861_v18  ;;  %v2151_v30 = vld [vmem:[%s4229_s16 + $0x60] sm:$0xff]  ;;  %s3202_s16 = sshll.u32 %s3995_s25, 10  ;;  %p3805_p5 = pnand %p3804_p1, %p5339_p3 }
 0x316   : > { %v2119_v11 = vadd.f32 %v4986_v36, %v2091_v2  ;;  %v2093_v50 = vmax.f32 %v2077_v45, %v4864_v14  ;;  %v2175_v4 = vpack.c.bf16 %v2165_v56, %v2163_v24  ;;  %v3611_v26 = vld [vmem:[#allocation11] ss:$8 sps:$4 sm:$0xff]   ;;  %s5108_s27 = scalar_lea.hbm %s5338_s18, %s3202_s16  ;;  %s3906_s25 = smov [#allocation14]  }
 0x317   : > { %v2120_v59 = vadd.f32 %v4972_v20, %v2092_v54  ;;  %v2094_v60 = vmax.f32 %v2078_v35, %v5331_v3  ;;  %v2176_v46 = vpack.c.bf16 %v2166_v16, %v2164_v10  ;;  %3314 = vmatpush3.bf16.msra.mxu1 %v3604_v28  ;;  %v3616_v10 = vld [vmem:[#allocation11 + $0x14] ss:$8 sps:$4 sm:$0xff]   ;;  %p3806_p11 = pneg %p3805_p5  ;;  %s3807_s29 = sshll.u32 %s3906_s25, 4  ;;  %s3808_s29 = int_to_ptr.vmem [resolvable:$false] %s3807_s29 }
 0x318   : > { %v2135_v32 = vmax.f32 %v2119_v11, 0.0  ;;  %v2121_v34 = vadd.f32 %v4986_v36, %v2093_v50  ;;  %3315 = vmatprep.subr.bf16.mxu1 %v3605_v40  ;;  %v3614_v11 = vld [vmem:[#allocation11 + $0x10] ss:$8 sps:$4 sm:$0xff]   ;;  %s3809_s15 = scalar_lea.vmem %s3808_s29, 2048  ;;  %p3810_p12 = scmp.lt.s32.totalorder %s5102_s5, %s3808_s29 }
 0x319   : > { %v2136_v18 = vmax.f32 %v2120_v59, 0.0  ;;  %v2122_v62 = vadd.f32 %v4972_v20, %v2094_v60  ;;  %v3608_v20 = vld [vmem:[#allocation10 + $0x28] sm:$0xff]   ;;  %p3811_p6 = scmp.lt.s32.totalorder %s3809_s15, %s3803_s30 }
 0x31a   : > { %v2137_v14 = vmax.f32 %v2121_v34, 0.0  ;;  %2355 = vmatmul.mubr.bf16.gmra.mrb[100].mxu1 %v2173_v0  ;;  %v2167_v57 = vmul.f32 %v2151_v30, %v2135_v32  ;;  %v3617_v32 = vld [vmem:[#allocation11 + $0x20] ss:$8 sps:$4 sm:$0xff]  }
 0x31b   : > { %v2138_v38 = vmax.f32 %v2122_v62, 0.0  ;;  %2362 = vmatprep.mubr.bf16.mxu1 %v2176_v46  ;;  %3316 = vmatpush3.bf16.msra.mxu1 %v3605_v40  ;;  %v2168_v7 = vmul.f32 %v2152_v51, %v2136_v18  ;;  %v3622_v18 = vld [vmem:[#allocation11 + $0x34] ss:$8 sps:$4 sm:$0xff]   ;;  %p3812_p13 = por %p3811_p6, %p3810_p12 }
 0x31c   : > { %v2169_v39 = vmul.f32 %v2153_v43, %v2137_v14  ;;  %3317 = vmatprep.subr.bf16.mxu1 %v3606_v48  ;;  %v3620_v14 = vld [vmem:[#allocation11 + $0x30] ss:$8 sps:$4 sm:$0xff]  }
 0x31d   : > { %v2170_v53 = vmul.f32 %v2154_v19, %v2138_v38  ;;  %v3625_v38 = vld [vmem:[#allocation11 + $0x44] ss:$8 sps:$4 sm:$0xff]   ;;  %p3813_p2 = pnand %p3812_p13, %p3806_p11 }
 0x31e   : > { %v2177_v36 = vpack.c.bf16 %v2169_v39, %v2167_v57 }
 0x31f   : > { %v2178_v33 = vpack.c.bf16 %v2170_v53, %v2168_v7  ;;  %3318 = vmatpush3.bf16.msra.mxu1 %v3606_v48  ;;  %v3623_v7 = vld [vmem:[#allocation11 + $0x40] ss:$8 sps:$4 sm:$0xff]  }
 0x320   : > { %3319 = vmatprep.subr.bf16.mxu1 %v3607_v58 }
 0x322   : > { %2363 = vmatmul.mubr.bf16.gmra.mrb[104].mxu1 %v2175_v4  ;;  %v3619_v4 = vld [vmem:[#allocation11 + $0x24] ss:$8 sps:$4 sm:$0xff]  }
 0x323   : > { %2370 = vmatprep.mubr.bf16.mxu1 %v2178_v33  ;;  %3320 = vmatpush3.bf16.msra.mxu1 %v3607_v58  ;;  %v3626_v33 = vld [vmem:[#allocation11 + $0x50] ss:$8 sps:$4 sm:$0xff]   ;;  %v5333_v58 = vmov 0  }
 0x324   : > { %3321 = vmatprep.subr.bf16.mxu1 %v3608_v20 }
 0x327   : > { %3322 = vmatpush3.bf16.msra.mxu1 %v3608_v20  ;;  %v3631_v20 = vld [vmem:[#allocation11 + $0x64] ss:$8 sps:$4 sm:$0xff]  }
 0x328   : > { %3323 = vmatprep.subr.bf16.mxu1 %v3609_v8 }
 0x32a   : > { %2371 = vmatmul.mubr.bf16.gmra.mrb[108].mxu1 %v2177_v36  ;;  %v3628_v36 = vld [vmem:[#allocation11 + $0x54] ss:$8 sps:$4 sm:$0xff]  }
 0x32b   : > { %3324 = vmatpush3.bf16.msra.mxu1 %v3609_v8  ;;  %v3629_v8 = vld [vmem:[#allocation11 + $0x60] ss:$8 sps:$4 sm:$0xff]  }
 0x32c   : > { %3325 = vmatprep.subr.bf16.mxu1 %v3610_v52 }
 0x32f   : > { %3326 = vmatpush3.bf16.msra.mxu1 %v3610_v52  ;;  %v3634_v52 = vld [vmem:[#allocation11 + $0x74] ss:$8 sps:$4 sm:$0xff]  }
 0x330   : > { %2647 = vmatprep.subr.bf16.mxu1 %v3613_v41  ;;  %v3632_v41 = vld [vmem:[#allocation11 + $0x70] ss:$8 sps:$4 sm:$0xff]  }
 0x3e5   : > { %v3219_v9 = vpop.f32.mrb[96].mxu1 }
 0x3e6   : > { %v3220_v0 = vpop.f32.mrb[97].mxu1 }
 0x3e7   : > { %v3221_v63 = vadd.f32 %v3220_v0, %v3219_v9  ;;  %v3222_v61 = vpop.f32.mrb[98].mxu1  ;;  %v2752_v9 = vld [vmem:[#allocation13 + $0x80] sm:$0xff] }
 0x3e8   : > { %v3223_v5 = vpop.f32.mrb[99].mxu1 }
 0x3e9   : > { %v2349_v21 = vadd.f32 %v3221_v63, %v3151_v44  ;;  %v3224_v28 = vadd.f32 %v3223_v5, %v3222_v61  ;;  %v3168_v63 = vld [vmem:[%s5334_s12] ss:$0 sm:$0xff] }
 0x3eb   : > { %v2352_v47 = vadd.f32 %v3224_v28, %v3151_v44  ;;  %v2379_v42 = vmax.f32 %v2349_v21, 0.0 }
 0x3ed   : > { %v2380_v15 = vmax.f32 %v2352_v47, 0.0  ;;  %v3225_v49 = vpop.f32.mrb[100].mxu1 }
 0x3ee   : > { %v3226_v31 = vpop.f32.mrb[101].mxu1 }
 0x3ef   : > { %v3227_v23 = vadd.f32 %v3226_v31, %v3225_v49  ;;  %v3228_v13 = vpop.f32.mrb[102].mxu1  ;;  %v2387_v27 = vpack.c.bf16 %v2380_v15, %v2379_v42  ;;  %v2736_v31 = vld [vmem:[#allocation13] sm:$0xff] }
 0x3f0   : > { %v3229_v12 = vpop.f32.mrb[103].mxu1 }
 0x3f1   : > { %v2357_v25 = vadd.f32 %v3227_v23, %v3151_v44  ;;  %v3230_v37 = vadd.f32 %v3229_v12, %v3228_v13  ;;  %3327 = vmatprep.mubr.bf16.mxu1 %v2387_v27  ;;  %v2737_v23 = vld [vmem:[#allocation13 + $0x8] sm:$0xff]  ;;  %v2754_v12 = vld [vmem:[#allocation13 + $0x90] sm:$0xff] }
 0x3f3   : > { %v2360_v22 = vadd.f32 %v3230_v37, %v3151_v44  ;;  %v2381_v1 = vmax.f32 %v2357_v25, 0.0  ;;  %v2755_v25 = vld [vmem:[#allocation13 + $0x98] sm:$0xff] }
 0x3f5   : > { %v2382_v55 = vmax.f32 %v2360_v22, 0.0  ;;  %v3231_v24 = vpop.f32.mrb[104].mxu1 }
 0x3f6   : > { %v3232_v45 = vpop.f32.mrb[105].mxu1 }
 0x3f7   : > { %v2388_v56 = vpack.c.bf16 %v2382_v55, %v2381_v1  ;;  %v3233_v2 = vadd.f32 %v3232_v45, %v3231_v24  ;;  %v3234_v40 = vpop.f32.mrb[106].mxu1  ;;  %v3337_v55 = vpack.c.bf16 %v2737_v23, %v2736_v31  ;;  %v3339_v45 = vpack.c.bf16 %v2755_v25, %v2754_v12  ;;  %v2767_v31 = vld [vmem:[#allocation13 + $0xf8] sm:$0xff] }
 0x3f8   : > { %v3235_v35 = vpop.f32.mrb[107].mxu1 }
 0x3f9   : > { %v2365_v16 = vadd.f32 %v3233_v2, %v3151_v44  ;;  %v3236_v54 = vadd.f32 %v3235_v35, %v3234_v40  ;;  %3328 = vmatmul.mubr.bf16.vlgmr.msra.gmra.mrb[112].mxu1 %v2388_v56  ;;  %v2739_v56 = vld [vmem:[#allocation13 + $0x18] sm:$0xff]  ;;  %v2756_v2 = vld [vmem:[#allocation13 + $0xa0] sm:$0xff]  ;;  %v2757_v40 = vld [vmem:[#allocation13 + $0xa8] sm:$0xff] }
 0x3fa   : > { %2648 = vmatpush1.bf16.msra.mxu1 %v3611_v26  ;;  %v2738_v26 = vld [vmem:[#allocation13 + $0x10] sm:$0xff]  ;;  %v3343_v35 = vpack.c.bf16 %v2757_v40, %v2756_v2 }
 0x3fb   : > { %v2368_v50 = vadd.f32 %v3236_v54, %v3151_v44  ;;  %2649 = vmatprep.subr.bf16.mxu1 %v3616_v10  ;;  %v2383_v59 = vmax.f32 %v2365_v16, 0.0  ;;  %v3341_v10 = vpack.c.bf16 %v2739_v56, %v2738_v26  ;;  %v2740_v16 = vld [vmem:[#allocation13 + $0x20] sm:$0xff]  ;;  %v2741_v54 = vld [vmem:[#allocation13 + $0x28] sm:$0xff] }
 0x3fd   : > { %v2384_v3 = vmax.f32 %v2368_v50, 0.0  ;;  %v3237_v60 = vpop.f32.mrb[108].mxu1  ;;  %v2759_v50 = vld [vmem:[#allocation13 + $0xb8] sm:$0xff] }
 0x3fe   : > { %v3238_v46 = vpop.f32.mrb[109].mxu1  ;;  %2650 = vmatpush1.bf16.msra.mxu1 %v3614_v11  ;;  %v2758_v11 = vld [vmem:[#allocation13 + $0xb0] sm:$0xff] }
 0x3ff   : > { %v3239_v34 = vadd.f32 %v3238_v46, %v3237_v60  ;;  %v3240_v48 = vpop.f32.mrb[110].mxu1  ;;  %v2389_v30 = vpack.c.bf16 %v2384_v3, %v2383_v59  ;;  %2651 = vmatprep.subr.bf16.mxu1 %v3619_v4  ;;  %v3345_v4 = vpack.c.bf16 %v2741_v54, %v2740_v16  ;;  %v3347_v3 = vpack.c.bf16 %v2759_v50, %v2758_v11  ;;  %v2742_v60 = vld [vmem:[#allocation13 + $0x30] sm:$0xff]  ;;  %v2743_v46 = vld [vmem:[#allocation13 + $0x38] sm:$0xff] }
 0x400   : > { %v3241_v43 = vpop.f32.mrb[111].mxu1 }
 0x401   : > { %v2373_v62 = vadd.f32 %v3239_v34, %v3151_v44  ;;  %v3242_v51 = vadd.f32 %v3241_v43, %v3240_v48  ;;  %3331 = vmatprep.mubr.bf16.mxu1 %v2389_v30  ;;  %v2760_v48 = vld [vmem:[#allocation13 + $0xc0] sm:$0xff]  ;;  %v2761_v30 = vld [vmem:[#allocation13 + $0xc8] sm:$0xff] }
 0x402   : > { %2652 = vmatpush1.bf16.msra.mxu1 %v3617_v32 }
 0x403   : > { %v2376_v19 = vadd.f32 %v3242_v51, %v3151_v44  ;;  %2653 = vmatprep.subr.bf16.mxu1 %v3622_v18  ;;  %v2385_v57 = vmax.f32 %v2373_v62, 0.0  ;;  %v2753_v44 = vld [vmem:[#allocation13 + $0x88] sm:$0xff] }
 0x404   : > { %v3335_v0 = vpack.c.bf16 %v2753_v44, %v2752_v9 }
 0x405   : > { %v2386_v39 = vmax.f32 %v2376_v19, 0.0 }
 0x406   : > { %2654 = vmatpush1.bf16.msra.mxu1 %v3620_v14  ;;  %v3349_v14 = vpack.c.bf16 %v2743_v46, %v2742_v60 }
 0x407   : > { %v2390_v53 = vpack.c.bf16 %v2386_v39, %v2385_v57  ;;  %2655 = vmatprep.subr.bf16.mxu1 %v3625_v38  ;;  %v3351_v38 = vpack.c.bf16 %v2761_v30, %v2760_v48  ;;  %v2744_v57 = vld [vmem:[#allocation13 + $0x40] sm:$0xff]  ;;  %v2745_v39 = vld [vmem:[#allocation13 + $0x48] sm:$0xff] }
 0x409   : > { %3332 = vmatmul.mubr.bf16.gmra.mrb[116].mxu1 %v2390_v53 }
 0x40a   : > { %2656 = vmatpush1.bf16.msra.mxu1 %v3623_v7  ;;  %2679 = vmatprep.mubr.bf16.mxu1 %v5333_v58 }
 0x40b   : > { %2657 = vmatprep.subr.bf16.mxu1 %v3628_v36  ;;  %v2762_v36 = vld [vmem:[#allocation13 + $0xd0] sm:$0xff] }
 0x40e   : > { %2658 = vmatpush1.bf16.msra.mxu1 %v3626_v33  ;;  %v2763_v33 = vld [vmem:[#allocation13 + $0xd8] sm:$0xff] }
 0x40f   : > { %2659 = vmatprep.subr.bf16.mxu1 %v3631_v20  ;;  %v3355_v44 = vpack.c.bf16 %v2763_v33, %v2762_v36 }
 0x412   : > { %2660 = vmatpush1.bf16.msra.mxu1 %v3629_v8 }
 0x413   : > { %2661 = vmatprep.subr.bf16.mxu1 %v3634_v52 }
 0x416   : > { %2662 = vmatpush1.bf16.msra.mxu1 %v3632_v41  ;;  %v3353_v41 = vpack.c.bf16 %v2745_v39, %v2744_v57 }
 0x417   : > { %3336 = vmatprep.subr.bf16.mxu1 %v3335_v0  ;;  %v2746_v0 = vld [vmem:[#allocation13 + $0x50] sm:$0xff] }
 0x4cc   : > { %v3329_v61 = vpop.f32.mrb[112].mxu1 }
 0x4cd   : > { %v2505_v5 = vadd.f32 %v3329_v61, %v3168_v63  ;;  %v2496_v21 = vpop.f32.mrb[113].mxu1  ;;  %v2747_v61 = vld [vmem:[#allocation13 + $0x58] sm:$0xff] }
 0x4ce   : > { %v2497_v28 = vadd.f32 %v3168_v63, %v2496_v21  ;;  %v3330_v47 = vpop.f32.mrb[114].mxu1  ;;  %v3357_v21 = vpack.c.bf16 %v2747_v61, %v2746_v0 }
 0x4cf   : > { %v2508_v42 = vadd.f32 %v3330_v47, %v3168_v63  ;;  %v2499_v15 = vpop.f32.mrb[115].mxu1  ;;  %v2529_v13 = vmax.f32 %v2505_v5, 0.0  ;;  %v2764_v5 = vld [vmem:[#allocation13 + $0xe0] sm:$0xff] }
 0x4d0   : > { %v2500_v49 = vadd.f32 %v3168_v63, %v2499_v15  ;;  %v2527_v37 = vmax.f32 %v2497_v28, 0.0  ;;  %v2748_v47 = vld [vmem:[#allocation13 + $0x60] sm:$0xff] }
 0x4d1   : > { %v2530_v27 = vmax.f32 %v2508_v42, 0.0  ;;  %v2749_v42 = vld [vmem:[#allocation13 + $0x68] sm:$0xff] }
 0x4d2   : > { %v2528_v22 = vmax.f32 %v2500_v49, 0.0  ;;  %v3361_v15 = vpack.c.bf16 %v2749_v42, %v2748_v47  ;;  %v2766_v49 = vld [vmem:[#allocation13 + $0xf0] sm:$0xff] }
 0x4d3   : > { %v2536_v1 = vpack.c.bf16 %v2530_v27, %v2529_v13  ;;  %v3363_v23 = vpack.c.bf16 %v2767_v31, %v2766_v49  ;;  %v2750_v13 = vld [vmem:[#allocation13 + $0x70] sm:$0xff]  ;;  %v2751_v27 = vld [vmem:[#allocation13 + $0x78] sm:$0xff] }
 0x4d4   : > { %v2535_v24 = vpack.c.bf16 %v2528_v22, %v2527_v37  ;;  %v3365_v12 = vpack.c.bf16 %v2751_v27, %v2750_v13 }
 0x4d6   : > { %2680 = vmatmul.mubr.bf16.vlgmr.msra.gmra.mrb[120].mxu1 %v2535_v24 }
 0x4d7   : > { %2689 = vmatprep.mubr.bf16.mxu1 %v5333_v58  ;;  %3338 = vmatpush3.bf16.msra.mxu1 %v3337_v55 }
 0x4d8   : > { %3340 = vmatprep.subr.bf16.mxu1 %v3339_v45 }
 0x4db   : > { %3342 = vmatpush3.bf16.msra.mxu1 %v3341_v10 }
 0x4dc   : > { %v3333_v59 = vpop.f32.mrb[116].mxu1  ;;  %3344 = vmatprep.subr.bf16.mxu1 %v3343_v35 }
 0x4dd   : > { %v2521_v32 = vadd.f32 %v3333_v59, %v3168_v63  ;;  %v2512_v34 = vpop.f32.mrb[117].mxu1 }
 0x4de   : > { %v2513_v18 = vadd.f32 %v3168_v63, %v2512_v34  ;;  %v3334_v43 = vpop.f32.mrb[118].mxu1  ;;  %2690 = vmatmul.mubr.bf16.gmra.mrb[124].mxu1 %v2536_v1 }
 0x4df   : > { %v2524_v62 = vadd.f32 %v3334_v43, %v3168_v63  ;;  %v2515_v51 = vpop.f32.mrb[119].mxu1  ;;  %2699 = vmatprep.mubr.bf16.mxu1 %v5333_v58  ;;  %3346 = vmatpush3.bf16.msra.mxu1 %v3345_v4  ;;  %v2533_v7 = vmax.f32 %v2521_v32, 0.0 }
 0x4e0   : > { %v2516_v19 = vadd.f32 %v3168_v63, %v2515_v51  ;;  %3348 = vmatprep.subr.bf16.mxu1 %v3347_v3  ;;  %v2531_v20 = vmax.f32 %v2513_v18, 0.0  ;;  %v2765_v63 = vld [vmem:[#allocation13 + $0xe8] sm:$0xff] }
 0x4e1   : > { %v2534_v53 = vmax.f32 %v2524_v62, 0.0  ;;  %v3359_v28 = vpack.c.bf16 %v2765_v63, %v2764_v5  ;;  %v3193_v63 = vld [vmem:[%s5336_s21] ss:$0 sm:$0xff] }
 0x4e2   : > { %v2532_v8 = vmax.f32 %v2516_v19, 0.0 }
 0x4e3   : > { %v2538_v52 = vpack.c.bf16 %v2534_v53, %v2533_v7  ;;  %3350 = vmatpush3.bf16.msra.mxu1 %v3349_v14 }
 0x4e4   : > { %v2537_v9 = vpack.c.bf16 %v2532_v8, %v2531_v20  ;;  %3352 = vmatprep.subr.bf16.mxu1 %v3351_v38 }
 0x4e6   : > { %2700 = vmatmul.mubr.bf16.gmra.mrb[128].mxu1 %v2537_v9 }
 0x4e7   : > { %2709 = vmatprep.mubr.bf16.mxu1 %v5333_v58  ;;  %3354 = vmatpush3.bf16.msra.mxu1 %v3353_v41  ;;  %v2555_v58 = vld [vmem:[%s5335_s3] sm:$0x3] }
 0x4e8   : > { %3356 = vmatprep.subr.bf16.mxu1 %v3355_v44  ;;  %v2560_v25 = vrot.slane %v2555_v58, %v2099_v29  ;;  %v2564_v37 = vrot.slane %v2555_v58, %v2103_v17 }
 0x4eb   : > { %3358 = vmatpush3.bf16.msra.mxu1 %v3357_v21 }
 0x4ec   : > { %3360 = vmatprep.subr.bf16.mxu1 %v3359_v28 }
 0x4ee   : > { %2710 = vmatmul.mubr.bf16.gmra.mrb[132].mxu1 %v2538_v52 }
 0x4ef   : > { %3362 = vmatpush3.bf16.msra.mxu1 %v3361_v15 }
 0x4f0   : > { %3364 = vmatprep.subr.bf16.mxu1 %v3363_v23 }
 0x4f3   : > { %3366 = vmatpush3.bf16.msra.mxu1 %v3365_v12 }
 0x5a9   : > { %v2681_v22 = vpop.f32.mrb[120].mxu1 }
 0x5aa   : > { %v2682_v1 = vadd.f32 %v2681_v22, %v2560_v25  ;;  %v2683_v55 = vpop.f32.mrb[121].mxu1 }
 0x5ab   : > { %v2684_v24 = vadd.f32 %v2683_v55, %v2564_v37  ;;  %v2685_v45 = vpop.f32.mrb[122].mxu1 }
 0x5ac   : > { %v2687_v26 = vpop.f32.mrb[123].mxu1  ;;  %v2720_v40 = vmax.f32 %v2682_v1, 0.0  ;;  %v2686_v10 = vadd.f32 %v2685_v45, %v2560_v25 }
 0x5ad   : > { %v2721_v56 = vmax.f32 %v2684_v24, 0.0  ;;  %v2688_v2 = vadd.f32 %v2687_v26, %v2564_v37 }
 0x5ae   : > { %v2722_v54 = vmax.f32 %v2686_v10, 0.0 }
 0x5af   : > { %v2723_v35 = vmax.f32 %v2688_v2, 0.0  ;;  %2839 = vmatprep.mubr.f32.mxu1 %v2721_v56 }
 0x5b0   : > { %2840 = vmatmul.mubr.f32.vlgmr.msra.gmra.mrb[136].mxu1 %v2720_v40 }
 0x5b1   : > { %v2691_v16 = vpop.f32.mrb[124].mxu1  ;;  %2844 = vmatprep.mubr.f32.mxu1 %v2723_v35 }
 0x5b2   : > { %v2692_v29 = vadd.f32 %v2691_v16, %v2560_v25  ;;  %v2693_v11 = vpop.f32.mrb[125].mxu1 }
 0x5b3   : > { %v2694_v6 = vadd.f32 %v2693_v11, %v2564_v37  ;;  %v2695_v17 = vpop.f32.mrb[126].mxu1 }
 0x5b4   : > { %v2697_v50 = vpop.f32.mrb[127].mxu1  ;;  %2845 = vmatmul.mubr.f32.gmra.mrb[138].mxu1 %v2722_v54  ;;  %v2724_v3 = vmax.f32 %v2692_v29, 0.0  ;;  %v2696_v60 = vadd.f32 %v2695_v17, %v2560_v25 }
 0x5b5   : > { %v2725_v4 = vmax.f32 %v2694_v6, 0.0  ;;  %v2698_v59 = vadd.f32 %v2697_v50, %v2564_v37 }
 0x5b6   : > { %v2726_v34 = vmax.f32 %v2696_v60, 0.0 }
 0x5b7   : > { %v2727_v46 = vmax.f32 %v2698_v59, 0.0  ;;  %2849 = vmatprep.mubr.f32.mxu1 %v2725_v4 }
 0x5b8   : > { %2850 = vmatmul.mubr.f32.gmra.mrb[140].mxu1 %v2724_v3 }
 0x5b9   : > { %v2701_v32 = vpop.f32.mrb[128].mxu1  ;;  %2854 = vmatprep.mubr.f32.mxu1 %v2727_v46 }
 0x5ba   : > { %v2702_v48 = vadd.f32 %v2701_v32, %v2560_v25  ;;  %v2703_v30 = vpop.f32.mrb[129].mxu1 }
 0x5bb   : > { %v2704_v18 = vadd.f32 %v2703_v30, %v2564_v37  ;;  %v2705_v43 = vpop.f32.mrb[130].mxu1 }
 0x5bc   : > { %v2707_v62 = vpop.f32.mrb[131].mxu1  ;;  %2855 = vmatmul.mubr.f32.gmra.mrb[142].mxu1 %v2726_v34  ;;  %v2728_v19 = vmax.f32 %v2702_v48, 0.0  ;;  %v2706_v38 = vadd.f32 %v2705_v43, %v2560_v25 }
 0x5bd   : > { %v2729_v51 = vmax.f32 %v2704_v18, 0.0  ;;  %v2708_v14 = vadd.f32 %v2707_v62, %v2564_v37 }
 0x5be   : > { %v2730_v7 = vmax.f32 %v2706_v38, 0.0 }
 0x5bf   : > { %v2731_v57 = vmax.f32 %v2708_v14, 0.0  ;;  %2859 = vmatprep.mubr.f32.mxu1 %v2729_v51 }
 0x5c0   : > { %2860 = vmatmul.mubr.f32.gmra.mrb[144].mxu1 %v2728_v19 }
 0x5c1   : > { %v2711_v39 = vpop.f32.mrb[132].mxu1  ;;  %2864 = vmatprep.mubr.f32.mxu1 %v2731_v57 }
 0x5c2   : > { %v2712_v53 = vadd.f32 %v2711_v39, %v2560_v25  ;;  %v2713_v36 = vpop.f32.mrb[133].mxu1 }
 0x5c3   : > { %v2714_v33 = vadd.f32 %v2713_v36, %v2564_v37  ;;  %v2715_v20 = vpop.f32.mrb[134].mxu1 }
 0x5c4   : > { %v2717_v8 = vpop.f32.mrb[135].mxu1  ;;  %2865 = vmatmul.mubr.f32.gmra.mrb[146].mxu1 %v2730_v7  ;;  %v2732_v9 = vmax.f32 %v2712_v53, 0.0  ;;  %v2716_v44 = vadd.f32 %v2715_v20, %v2560_v25 }
 0x5c5   : > { %v2733_v52 = vmax.f32 %v2714_v33, 0.0  ;;  %v2718_v41 = vadd.f32 %v2717_v8, %v2564_v37 }
 0x5c6   : > { %v2734_v61 = vmax.f32 %v2716_v44, 0.0 }
 0x5c7   : > { %v2735_v0 = vmax.f32 %v2718_v41, 0.0  ;;  %2869 = vmatprep.mubr.f32.mxu1 %v2733_v52 }
 0x5c8   : > { %2870 = vmatmul.mubr.f32.gmra.mrb[148].mxu1 %v2732_v9 }
 0x5c9   : > { %2874 = vmatprep.mubr.f32.mxu1 %v2735_v0 }
 0x5cc   : > { %2875 = vmatmul.mubr.f32.gmra.mrb[150].mxu1 %v2734_v61 }
 0x683   : > { %v3287_v5 = vpop.f32.mrb[136].mxu1 }
 0x684   : > { %v3288_v21 = vpop.f32.mrb[137].mxu1 }
 0x685   : > { %v3289_v28 = vadd.f32 %v3288_v21, %v3287_v5 }
 0x687   : > { %v2842_v47 = vadd.f32 %v3289_v28, %v3193_v63  ;;  %v3290_v42 = vpop.f32.mrb[138].mxu1 }
 0x688   : > { %v3291_v15 = vpop.f32.mrb[139].mxu1 }
 0x689   : > { %2880 = vst [vmem:[%s5092_s13] sm:$0xff] %v2842_v47  ;;  %v3292_v49 = vadd.f32 %v3291_v15, %v3290_v42 }
 0x68b   : > { %v2847_v31 = vadd.f32 %v3292_v49, %v3193_v63  ;;  %v3293_v23 = vpop.f32.mrb[140].mxu1 }
 0x68c   : > { %v3294_v13 = vpop.f32.mrb[141].mxu1 }
 0x68d   : > { %2881 = vst [vmem:[%s5092_s13 + $0x8] sm:$0xff] %v2847_v31  ;;  %v3295_v27 = vadd.f32 %v3294_v13, %v3293_v23 }
 0x68f   : > { %v2852_v12 = vadd.f32 %v3295_v27, %v3193_v63  ;;  %v3296_v58 = vpop.f32.mrb[142].mxu1 }
 0x690   : > { %v3297_v25 = vpop.f32.mrb[143].mxu1 }
 0x691   : > { %2882 = vst [vmem:[%s5092_s13 + $0x10] sm:$0xff] %v2852_v12  ;;  %v3298_v37 = vadd.f32 %v3297_v25, %v3296_v58 }
 0x693   : > { %v2857_v22 = vadd.f32 %v3298_v37, %v3193_v63  ;;  %v3299_v1 = vpop.f32.mrb[144].mxu1 }
 0x694   : > { %v3300_v55 = vpop.f32.mrb[145].mxu1 }
 0x695   : > { %2883 = vst [vmem:[%s5092_s13 + $0x18] sm:$0xff] %v2857_v22  ;;  %v3301_v24 = vadd.f32 %v3300_v55, %v3299_v1 }
 0x697   : > { %v2862_v45 = vadd.f32 %v3301_v24, %v3193_v63  ;;  %v3302_v26 = vpop.f32.mrb[146].mxu1 }
 0x698   : > { %v3303_v56 = vpop.f32.mrb[147].mxu1 }
 0x699   : > { %2884 = vst [vmem:[%s5092_s13 + $0x20] sm:$0xff] %v2862_v45  ;;  %v3304_v2 = vadd.f32 %v3303_v56, %v3302_v26 }
 0x69b   : > { %v2867_v40 = vadd.f32 %v3304_v2, %v3193_v63  ;;  %v3305_v10 = vpop.f32.mrb[148].mxu1 }
 0x69c   : > { %v3306_v35 = vpop.f32.mrb[149].mxu1 }
 0x69d   : > { %2885 = vst [vmem:[%s5092_s13 + $0x28] sm:$0xff] %v2867_v40  ;;  %v3307_v16 = vadd.f32 %v3306_v35, %v3305_v10 }
 0x69f   : > { %v2872_v54 = vadd.f32 %v3307_v16, %v3193_v63  ;;  %v3308_v29 = vpop.f32.mrb[150].mxu1 }
 0x6a0   : > { %v3309_v11 = vpop.f32.mrb[151].mxu1 }
 0x6a1   : > { %2886 = vst [vmem:[%s5092_s13 + $0x30] sm:$0xff] %v2872_v54  ;;  %v3310_v6 = vadd.f32 %v3309_v11, %v3308_v29 }
 0x6a3   : > { %v2877_v17 = vadd.f32 %v3310_v6, %v3193_v63 }
 0x6a5   : > { %2887 = vst [vmem:[%s5092_s13 + $0x38] sm:$0xff] %v2877_v17 }
 0x6a6   : > { %3816 = shalt.err (!%p3813_p2)
}
 0x6a7   : > { %s3817_s12 = scalar_lea.hbm %s5108_s27, 1024  ;;  %s3821_s3 = scalar_lea.hbm %s5338_s18, 2048 }
 0x6a8   : > { %p3818_p0 = scmp.ne.s32.totalorder %s5108_s27, %s3817_s12  ;;  %p3822_p9 = scmp.lt.u32.totalorder %s5108_s27, %s5338_s18 }
 0x6a9   : > { %p3823_p10 = scmp.lt.u32.totalorder %s3821_s3, %s3817_s12  ;;  %p3825_p5 = scmp.lt.u32.totalorder %s3817_s12, %s5108_s27 }
 0x6aa   : > { %p3819_p7 = pnand %p3818_p0, %p5339_p3 }
 0x6ab   : > { %p3824_p1 = por %p3823_p10, %p3822_p9 }
 0x6ac   : > { %p3820_p8 = pneg %p3819_p7 }
 0x6ad   : > { %p3826_p11 = por %p3825_p5, %p3824_p1 }
 0x6af   : > { %p3827_p12 = pnand %p3826_p11, %p3820_p8 }
 0x6b1   : > { %3830 = shalt.err (!%p3827_p12)
}
 0x6b2   : > { %s3907_s9 = smov 128   ;;  %s3908_s21 = smov 8  }
 0x6b3   : > { %3414 = dma.vmem_to_hbm [thread:$0]  (%p5339_p3), %s5102_s5, 1024, %s5108_s27, %s2889_s26, %s3907_s9, %s3907_s9, %s3908_s21  }
 0x6b4 PF: > { %s5340_s13 = sld [smem:[#allocation24_spill]]  ;;  %s5341_s16 = sld [smem:[#allocation28_spill]] }
 0x6ba   : > { %s2917_s14 = sand.u32 1, %s5340_s13   ;;  %p5342_p6 = scmp.ne.s32.totalorder %s5341_s16, 0 }
 0x6bb   : > { %s2918_s11 = scalar_lea.sflag [#allocation4], %s2917_s14 }
 0x6bc   : > { %p3433_p13 = pnand %p3052_p4, %p5342_p6 }
 0x6be   : > { %3868 = dma.done.wait (!%p3433_p13), %s2918_s11, 1024  }
 0x6bf   : > { %3870 = vsyncadd (!%p3433_p13), %s2918_s11, 4294966272  ;;  %s5343_s24 = sld [smem:[#allocation25_spill]]  ;;  %s5344_s30 = sld [smem:[#allocation26_spill]] }
 0x6c0   : > { %s5345_s21 = smov %s3877_s22  ;;  %s5346_s22 = smov %s3881_s23 }
 0x6c5   : > { %p30_p2 = scmp.ge.s32.totalorder %s5343_s24, 4   ;;  %s5347_s23 = smov %s5344_s30 }
 0x6c7   :  { %32 = sbr.rel (!%p30_p2) target bundleno = 17 (0x11), region = 151 }
 0x6ce   :  { %2923 = vsyncpa [#allocation3], 1 }
 0x6cf   :  { %2925 = vsyncpa [#allocation3 + $0x1], 1 }
 0x6d0   :  { %2926 = vsyncpa [#allocation6], 1 }
 0x6d1   :  { %2928 = vsyncpa [#allocation6 + $0x1], 1 }
 0x6d2   :  { %2929 = vsyncpa [#allocation9], 1 }
 0x6d3   :  { %2930 = vsyncpa [#allocation12], 1 }
 0x6d4   :  { %2931 = vsyncpa [#allocation4], 1 }
 0x6d5   :  { %2933 = vsyncpa [#allocation4 + $0x1], 1 }

</bundles_post_ra>
